<compile_context>
chip_gen: v5e
topology: v5e:2x2
jax: 0.10.0
libtpu: 0.0.40
codegen_flags: <defaults>
</compile_context>

<pallas_src>
import numpy as np
import jax
import jax.numpy as jnp
from jax.experimental import pallas as pl
from jax.experimental.pallas import tpu as pltpu

# Fixed blur kernel from the PyTorch module (identical for every channel).
KERNEL_5x5 = np.array(
    [[0.0265, 0.0354, 0.039, 0.0354, 0.0265],
     [0.0354, 0.0473, 0.052, 0.0473, 0.0354],
     [0.039,  0.052,  0.0573, 0.052, 0.039],
     [0.0354, 0.0473, 0.052, 0.0473, 0.0354],
     [0.0265, 0.0354, 0.039, 0.0354, 0.0265]],
    dtype=np.float32,
)

_LANE = 128
_SUBLANE = 8


def _coeff_groups():
    """Group the 25 taps by coefficient (4-fold symmetry -> 6 groups)."""
    groups = {}
    for dy in range(5):
        for dx in range(5):
            groups.setdefault(float(KERNEL_5x5[dy, dx]), []).append((dy, dx))
    return tuple((c, tuple(taps)) for c, taps in groups.items())


_COEFF_GROUPS = _coeff_groups()  # 6 (coefficient, taps) groups, 25 taps total


def _blur_kernel(x_ref, o_ref):
    # x_ref: (H+4, W+4, TBC)  zero-padded, channels-last input block (VMEM)
    # o_ref: (H,   W,   TBC)  output block
    H, W, _ = o_ref.shape

    # Symmetric-coefficient accumulation: sum slices sharing a coefficient,
    # then one multiply per group (same coefficients, f32 accumulate).
    # dy offsets hit the leading (non-vreg) axis, dx offsets the sublane axis.
    acc = None
    for coeff, taps in _COEFF_GROUPS:
        grp = None
        for dy, dx in taps:
            sl = x_ref[dy:dy + H, dx:dx + W, :].astype(jnp.float32)
            grp = sl if grp is None else grp + sl
        term = coeff * grp
        acc = term if acc is None else acc + term

    o_ref[...] = acc.astype(o_ref.dtype)


def _round_up(x, m):
    return (x + m - 1) // m * m


def _block_bytes(rows, cols, lanes, itemsize=4):
    """f32 VMEM footprint of a (rows, cols, lanes) block with (8,128) tiling
    applied to the last two dims."""
    return rows * _round_up(cols, _SUBLANE) * _round_up(lanes, _LANE) * itemsize


def _vmem_budget():
    """(block budget, vmem_limit_bytes), derived per TPU generation."""
    try:
        cap = int(pltpu.get_tpu_info().vmem_capacity_bytes)
    except Exception:
        cap = 64 * 1024 * 1024  # assume the smallest VMEM (v7x) if query fails
    budget = cap // 2                                  # blocks use at most half
    limit = min(cap - 8 * 1024 * 1024, (cap * 3) // 4)  # headroom for Mosaic
    return budget, limit


def _pick_channel_tile(bc, h, w, budget_bytes):
    """Channel tile TBC and padded channel count BCp.

    TBC is the full (small) channel axis when bc <= 128 (lane axis cannot be
    split below a 128 multiple), otherwise the largest multiple of 128 that
    (a) fits `budget_bytes` with double-buffered in+out blocks and
    (b) leaves the grid with >= 2 steps (keeps both v7x TensorCores busy).
    """
    if bc <= _LANE:
        # TODO(synk): if a single (H+4, W+4, bc) block overflows the budget,
        # H-halo tiling is required (see module docstring).
        return bc, bc

    def footprint(tbc):
        in_b = _block_bytes(h + 4, w + 4, tbc)
        out_b = _block_bytes(h, w, tbc)
        return 2 * (in_b + out_b)  # x2 for BlockSpec double-buffering

    max_tbc = _round_up(bc, _LANE)
    cap = max(_LANE, (max_tbc // 2) // _LANE * _LANE)  # >= 2 grid steps
    tbc = _LANE
    t = _LANE
    while t <= cap and footprint(t) <= budget_bytes:
        tbc = t
        t += _LANE
    bcp = _round_up(bc, tbc)
    return tbc, bcp


def generator_b2a_ms(x):
    """x: (B, C, H, W) float32 -> depthwise 5x5 blur (padding=2, groups=C)."""
    B, C, H, W = x.shape
    BC = B * C

    budget, vmem_limit = _vmem_budget()
    TBC, BCp = _pick_channel_tile(BC, H, W, budget)

    # Channels-last (lane) layout with the conv zero-padding fused into the
    # same wrapper copy pass that the layout change requires anyway:
    #   (B, C, H, W) -> (H+4, W+4, BCp).
    xr = jnp.transpose(x.reshape(BC, H, W), (1, 2, 0))       # (H, W, BC)
    xp = jnp.pad(xr, ((2, 2), (2, 2), (0, BCp - BC)))        # (H+4, W+4, BCp)

    out = pl.pallas_call(
        _blur_kernel,
        out_shape=jax.ShapeDtypeStruct((H, W, BCp), x.dtype),
        grid=(BCp // TBC,),
        in_specs=[pl.BlockSpec((H + 4, W + 4, TBC), lambda i: (0, 0, i))],
        out_specs=pl.BlockSpec((H, W, TBC), lambda i: (0, 0, i)),
        compiler_params=pltpu.CompilerParams(
            dimension_semantics=("parallel",),
            vmem_limit_bytes=vmem_limit,
        ),
    )(xp)

    out = out[:, :, :BC]                                      # drop channel pad
    return jnp.transpose(out, (2, 0, 1)).reshape(B, C, H, W)


def _reference_numpy(x):
    # Direct numpy depthwise conv reference (padding=2, groups=C).
    B, C, H, W = x.shape
    xpad = np.pad(np.asarray(x, np.float32), ((0, 0), (0, 0), (2, 2), (2, 2)))
    out = np.zeros((B, C, H, W), np.float32)
    for dy in range(5):
        for dx in range(5):
            out += KERNEL_5x5[dy, dx] * xpad[:, :, dy:dy + H, dx:dx + W]
    return out


if __name__ == "__main__":
    key = jax.random.PRNGKey(0)
    B, C, H, W = 2, 4, 16, 16
    x = jax.random.normal(key, (B, C, H, W), dtype=jnp.float32)

    fn = jax.jit(generator_b2a_ms)
    out = fn(x)
    out = jax.block_until_ready(out)

    ref = _reference_numpy(np.asarray(x))
    np.testing.assert_allclose(np.asarray(out), ref, rtol=1e-5, atol=1e-5)

    print("KERNEL_OK")
</pallas_src>

<mosaic_0001>
module attributes {stable_mosaic.version = 11 : i64} {
  func.func @_blur_kernel(%arg0: i32, %arg1: memref<20x20x8xf32, #tpu.memory_space<vmem>>, %arg2: memref<16x16x8xf32, #tpu.memory_space<vmem>>) attributes {dimension_semantics = [#tpu.dimension_semantics<parallel>], iteration_bounds = array<i64: 1>, scalar_prefetch = 0 : i64, scratch_operands = 0 : i64, tpu.core_type = #tpu.core_type<tc>, window_params = [{transform_indices = @transform_0, window_bounds = array<i64: 20, 20, 8>}, {transform_indices = @transform_1, window_bounds = array<i64: 16, 16, 8>}]} {
    %c0 = arith.constant 0 : index
    %c0_0 = arith.constant 0 : index
    %c0_1 = arith.constant 0 : index
    %0 = vector.load %arg1[%c0, %c0_0, %c0_1] : memref<20x20x8xf32, #tpu.memory_space<vmem>>, vector<16x16x8xf32>
    %c0_2 = arith.constant 0 : index
    %c4 = arith.constant 4 : index
    %c0_3 = arith.constant 0 : index
    %1 = vector.load %arg1[%c0_2, %c4, %c0_3] : memref<20x20x8xf32, #tpu.memory_space<vmem>>, vector<16x16x8xf32>
    %2 = arith.addf %0, %1 : vector<16x16x8xf32>
    %c4_4 = arith.constant 4 : index
    %c0_5 = arith.constant 0 : index
    %c0_6 = arith.constant 0 : index
    %3 = vector.load %arg1[%c4_4, %c0_5, %c0_6] : memref<20x20x8xf32, #tpu.memory_space<vmem>>, vector<16x16x8xf32>
    %4 = arith.addf %2, %3 : vector<16x16x8xf32>
    %c4_7 = arith.constant 4 : index
    %c4_8 = arith.constant 4 : index
    %c0_9 = arith.constant 0 : index
    %5 = vector.load %arg1[%c4_7, %c4_8, %c0_9] : memref<20x20x8xf32, #tpu.memory_space<vmem>>, vector<16x16x8xf32>
    %6 = arith.addf %4, %5 : vector<16x16x8xf32>
    %cst = arith.constant 2.650000e-02 : f32
    %7 = vector.broadcast %cst : f32 to vector<16x16x8xf32>
    %8 = arith.mulf %7, %6 : vector<16x16x8xf32>
    %c0_10 = arith.constant 0 : index
    %c1 = arith.constant 1 : index
    %c0_11 = arith.constant 0 : index
    %9 = vector.load %arg1[%c0_10, %c1, %c0_11] : memref<20x20x8xf32, #tpu.memory_space<vmem>>, vector<16x16x8xf32>
    %c0_12 = arith.constant 0 : index
    %c3 = arith.constant 3 : index
    %c0_13 = arith.constant 0 : index
    %10 = vector.load %arg1[%c0_12, %c3, %c0_13] : memref<20x20x8xf32, #tpu.memory_space<vmem>>, vector<16x16x8xf32>
    %11 = arith.addf %9, %10 : vector<16x16x8xf32>
    %c1_14 = arith.constant 1 : index
    %c0_15 = arith.constant 0 : index
    %c0_16 = arith.constant 0 : index
    %12 = vector.load %arg1[%c1_14, %c0_15, %c0_16] : memref<20x20x8xf32, #tpu.memory_space<vmem>>, vector<16x16x8xf32>
    %13 = arith.addf %11, %12 : vector<16x16x8xf32>
    %c1_17 = arith.constant 1 : index
    %c4_18 = arith.constant 4 : index
    %c0_19 = arith.constant 0 : index
    %14 = vector.load %arg1[%c1_17, %c4_18, %c0_19] : memref<20x20x8xf32, #tpu.memory_space<vmem>>, vector<16x16x8xf32>
    %15 = arith.addf %13, %14 : vector<16x16x8xf32>
    %c3_20 = arith.constant 3 : index
    %c0_21 = arith.constant 0 : index
    %c0_22 = arith.constant 0 : index
    %16 = vector.load %arg1[%c3_20, %c0_21, %c0_22] : memref<20x20x8xf32, #tpu.memory_space<vmem>>, vector<16x16x8xf32>
    %17 = arith.addf %15, %16 : vector<16x16x8xf32>
    %c3_23 = arith.constant 3 : index
    %c4_24 = arith.constant 4 : index
    %c0_25 = arith.constant 0 : index
    %18 = vector.load %arg1[%c3_23, %c4_24, %c0_25] : memref<20x20x8xf32, #tpu.memory_space<vmem>>, vector<16x16x8xf32>
    %19 = arith.addf %17, %18 : vector<16x16x8xf32>
    %c4_26 = arith.constant 4 : index
    %c1_27 = arith.constant 1 : index
    %c0_28 = arith.constant 0 : index
    %20 = vector.load %arg1[%c4_26, %c1_27, %c0_28] : memref<20x20x8xf32, #tpu.memory_space<vmem>>, vector<16x16x8xf32>
    %21 = arith.addf %19, %20 : vector<16x16x8xf32>
    %c4_29 = arith.constant 4 : index
    %c3_30 = arith.constant 3 : index
    %c0_31 = arith.constant 0 : index
    %22 = vector.load %arg1[%c4_29, %c3_30, %c0_31] : memref<20x20x8xf32, #tpu.memory_space<vmem>>, vector<16x16x8xf32>
    %23 = arith.addf %21, %22 : vector<16x16x8xf32>
    %cst_32 = arith.constant 3.540000e-02 : f32
    %24 = vector.broadcast %cst_32 : f32 to vector<16x16x8xf32>
    %25 = arith.mulf %24, %23 : vector<16x16x8xf32>
    %26 = arith.addf %8, %25 : vector<16x16x8xf32>
    %c0_33 = arith.constant 0 : index
    %c2 = arith.constant 2 : index
    %c0_34 = arith.constant 0 : index
    %27 = vector.load %arg1[%c0_33, %c2, %c0_34] : memref<20x20x8xf32, #tpu.memory_space<vmem>>, vector<16x16x8xf32>
    %c2_35 = arith.constant 2 : index
    %c0_36 = arith.constant 0 : index
    %c0_37 = arith.constant 0 : index
    %28 = vector.load %arg1[%c2_35, %c0_36, %c0_37] : memref<20x20x8xf32, #tpu.memory_space<vmem>>, vector<16x16x8xf32>
    %29 = arith.addf %27, %28 : vector<16x16x8xf32>
    %c2_38 = arith.constant 2 : index
    %c4_39 = arith.constant 4 : index
    %c0_40 = arith.constant 0 : index
    %30 = vector.load %arg1[%c2_38, %c4_39, %c0_40] : memref<20x20x8xf32, #tpu.memory_space<vmem>>, vector<16x16x8xf32>
    %31 = arith.addf %29, %30 : vector<16x16x8xf32>
    %c4_41 = arith.constant 4 : index
    %c2_42 = arith.constant 2 : index
    %c0_43 = arith.constant 0 : index
    %32 = vector.load %arg1[%c4_41, %c2_42, %c0_43] : memref<20x20x8xf32, #tpu.memory_space<vmem>>, vector<16x16x8xf32>
    %33 = arith.addf %31, %32 : vector<16x16x8xf32>
    %cst_44 = arith.constant 3.900000e-02 : f32
    %34 = vector.broadcast %cst_44 : f32 to vector<16x16x8xf32>
    %35 = arith.mulf %34, %33 : vector<16x16x8xf32>
    %36 = arith.addf %26, %35 : vector<16x16x8xf32>
    %c1_45 = arith.constant 1 : index
    %c1_46 = arith.constant 1 : index
    %c0_47 = arith.constant 0 : index
    %37 = vector.load %arg1[%c1_45, %c1_46, %c0_47] : memref<20x20x8xf32, #tpu.memory_space<vmem>>, vector<16x16x8xf32>
    %c1_48 = arith.constant 1 : index
    %c3_49 = arith.constant 3 : index
    %c0_50 = arith.constant 0 : index
    %38 = vector.load %arg1[%c1_48, %c3_49, %c0_50] : memref<20x20x8xf32, #tpu.memory_space<vmem>>, vector<16x16x8xf32>
    %39 = arith.addf %37, %38 : vector<16x16x8xf32>
    %c3_51 = arith.constant 3 : index
    %c1_52 = arith.constant 1 : index
    %c0_53 = arith.constant 0 : index
    %40 = vector.load %arg1[%c3_51, %c1_52, %c0_53] : memref<20x20x8xf32, #tpu.memory_space<vmem>>, vector<16x16x8xf32>
    %41 = arith.addf %39, %40 : vector<16x16x8xf32>
    %c3_54 = arith.constant 3 : index
    %c3_55 = arith.constant 3 : index
    %c0_56 = arith.constant 0 : index
    %42 = vector.load %arg1[%c3_54, %c3_55, %c0_56] : memref<20x20x8xf32, #tpu.memory_space<vmem>>, vector<16x16x8xf32>
    %43 = arith.addf %41, %42 : vector<16x16x8xf32>
    %cst_57 = arith.constant 4.730000e-02 : f32
    %44 = vector.broadcast %cst_57 : f32 to vector<16x16x8xf32>
    %45 = arith.mulf %44, %43 : vector<16x16x8xf32>
    %46 = arith.addf %36, %45 : vector<16x16x8xf32>
    %c1_58 = arith.constant 1 : index
    %c2_59 = arith.constant 2 : index
    %c0_60 = arith.constant 0 : index
    %47 = vector.load %arg1[%c1_58, %c2_59, %c0_60] : memref<20x20x8xf32, #tpu.memory_space<vmem>>, vector<16x16x8xf32>
    %c2_61 = arith.constant 2 : index
    %c1_62 = arith.constant 1 : index
    %c0_63 = arith.constant 0 : index
    %48 = vector.load %arg1[%c2_61, %c1_62, %c0_63] : memref<20x20x8xf32, #tpu.memory_space<vmem>>, vector<16x16x8xf32>
    %49 = arith.addf %47, %48 : vector<16x16x8xf32>
    %c2_64 = arith.constant 2 : index
    %c3_65 = arith.constant 3 : index
    %c0_66 = arith.constant 0 : index
    %50 = vector.load %arg1[%c2_64, %c3_65, %c0_66] : memref<20x20x8xf32, #tpu.memory_space<vmem>>, vector<16x16x8xf32>
    %51 = arith.addf %49, %50 : vector<16x16x8xf32>
    %c3_67 = arith.constant 3 : index
    %c2_68 = arith.constant 2 : index
    %c0_69 = arith.constant 0 : index
    %52 = vector.load %arg1[%c3_67, %c2_68, %c0_69] : memref<20x20x8xf32, #tpu.memory_space<vmem>>, vector<16x16x8xf32>
    %53 = arith.addf %51, %52 : vector<16x16x8xf32>
    %cst_70 = arith.constant 5.200000e-02 : f32
    %54 = vector.broadcast %cst_70 : f32 to vector<16x16x8xf32>
    %55 = arith.mulf %54, %53 : vector<16x16x8xf32>
    %56 = arith.addf %46, %55 : vector<16x16x8xf32>
    %c2_71 = arith.constant 2 : index
    %c2_72 = arith.constant 2 : index
    %c0_73 = arith.constant 0 : index
    %57 = vector.load %arg1[%c2_71, %c2_72, %c0_73] : memref<20x20x8xf32, #tpu.memory_space<vmem>>, vector<16x16x8xf32>
    %cst_74 = arith.constant 5.730000e-02 : f32
    %58 = vector.broadcast %cst_74 : f32 to vector<16x16x8xf32>
    %59 = arith.mulf %58, %57 : vector<16x16x8xf32>
    %60 = arith.addf %56, %59 : vector<16x16x8xf32>
    %c0_75 = arith.constant 0 : index
    %c0_76 = arith.constant 0 : index
    %c0_77 = arith.constant 0 : index
    %61 = vector.load %arg2[%c0_75, %c0_76, %c0_77] : memref<16x16x8xf32, #tpu.memory_space<vmem>>, vector<16x16x8xf32>
    tpu.vector_store %arg2[%c0_75, %c0_76, %c0_77], %60 {strides = array<i32>} : memref<16x16x8xf32, #tpu.memory_space<vmem>>, vector<16x16x8xf32>,
    return
  }
  func.func @transform_0(%arg0: i32) -> (i32, i32, i32) {
    %c0_i32 = arith.constant 0 : i32
    %c0_i32_0 = arith.constant 0 : i32
    %c0_i32_1 = arith.constant 0 : i32
    return %c0_i32, %c0_i32_0, %arg0 : i32, i32, i32
  }
  func.func @transform_1(%arg0: i32) -> (i32, i32, i32) {
    %c0_i32 = arith.constant 0 : i32
    %c0_i32_0 = arith.constant 0 : i32
    %c0_i32_1 = arith.constant 0 : i32
    return %c0_i32, %c0_i32_0, %arg0 : i32, i32, i32
  }
}

</mosaic_0001>

<bundles_post_ra>
// kernel: generator_b2a_ms.1
= control target key start
LH: loop header
LB: loop body
LE: loop exit
PB: predicated region body
PF: predicated region fallthrough
CT: control target
= control target key end

     0   :  { %vm1772_vm0 = vcmask 64512   ;;  %s4254_s0 = inlined_call_operand.vmem [shape: f32[20,20,8], index: 0, kind: input, shape index: {}]   ;;  %s4255_s1 = inlined_call_operand.vmem [shape: f32[16,16,8], index: 1, kind: output, shape index: {}]  }
   0x1   :  { %v8_v0 = vld [vmem:[%s4254_s0] sm:$0xff]  ;;  %v1873_v7 = vld [vmem:[%s4254_s0 + $0x18] sm:$0xff]  ;;  %v2065_v13 = vld [vmem:[%s4254_s0 + $0x30] sm:$0xff] }
   0x2   :  { %v40_v1 = vld [vmem:[%s4254_s0 + $0x4] sm:$0xff]  ;;  %v1905_v9 = vld [vmem:[%s4254_s0 + $0x1c] sm:$0xff]  ;;  %v2097_v20 = vld [vmem:[%s4254_s0 + $0x34] sm:$0xff] }
   0x3   :  { %v72_v2 = vadd.f32 %v40_v1, %v8_v0  ;;  %v265_v3 = vld [vmem:[%s4254_s0 + $0x1] sm:$0xff]  ;;  %v2161_v16 = vld [vmem:[%s4254_s0 + $0x19] sm:$0xff]  ;;  %v2515_v23 = vld [vmem:[%s4254_s0 + $0x4c] sm:$0xff]  ;;  %v2530_v28 = vadd.f32 %v1905_v9, %v1873_v7  ;;  %v2558_v43 = vadd.f32 %v2097_v20, %v2065_v13 }
   0x4   :  { %v297_v4 = vld [vmem:[%s4254_s0 + $0x3] sm:$0xff]  ;;  %v2193_v17 = vld [vmem:[%s4254_s0 + $0x1b] sm:$0xff]  ;;  %v2321_v27 = vld [vmem:[%s4254_s0 + $0x31] sm:$0xff] }
   0x5   :  { %v2474_v5 = vld [vmem:[%s4254_s0 + $0x60] sm:$0xff]  ;;  %v329_v6 = vadd.f32 %v297_v4, %v265_v3  ;;  %v2504_v19 = vld [vmem:[%s4254_s0 + $0x48] sm:$0xff]  ;;  %v1164_v21 = vadd.f32 %v2193_v17, %v2161_v16  ;;  %v2353_v39 = vld [vmem:[%s4254_s0 + $0x33] sm:$0xff] }
   0x6   :  { %v137_v8 = vadd.f32 %v2474_v5, %v72_v2  ;;  %v2486_v10 = vld [vmem:[%s4254_s0 + $0x64] sm:$0xff]  ;;  %v2289_v22 = vld [vmem:[%s4254_s0 + $0x1a] sm:$0xff]  ;;  %v41_v35 = vld [vmem:[%s4254_s0 + $0xc] sm:$0xff]  ;;  %v2611_v0 = vadd.f32 %v2353_v39, %v2321_v27 }
   0x7   :  { %v394_v11 = vadd.f32 %v1873_v7, %v329_v6  ;;  %v811_v12 = vld [vmem:[%s4254_s0 + $0x2] sm:$0xff]  ;;  %v878_v29 = vadd.f32 %v2289_v22, %v2504_v19  ;;  %v2538_v32 = vld [vmem:[%s4254_s0 + $0x4b] sm:$0xff]  ;;  %v1452_v33 = vadd.f32 %v2321_v27, %v2289_v22  ;;  %v396_v36 = vadd.f32 %v2065_v13, %v1164_v21  ;;  %v2608_v62 = vld [vmem:[%s4254_s0 + $0x38] sm:$0xff] }
   0x8   :  { %v201_v14 = vadd.f32 %v2486_v10, %v137_v8  ;;  %v876_v15 = vadd.f32 %v2065_v13, %v811_v12  ;;  %v2520_v25 = vld [vmem:[%s4254_s0 + $0x62] sm:$0xff]  ;;  %v2553_v40 = vld [vmem:[%s4254_s0 + $0x32] sm:$0xff]  ;;  %v2583_v52 = vld [vmem:[%s4254_s0 + $0x4a] sm:$0xff] }
   0x9   :  { %v458_v18 = vadd.f32 %v1905_v9, %v394_v11  ;;  %v2525_v26 = vld [vmem:[%s4254_s0 + $0x49] sm:$0xff]  ;;  %v1516_v46 = vadd.f32 %v2353_v39, %v1452_v33  ;;  %v2573_v49 = vld [vmem:[%s4254_s0 + $0x20] sm:$0xff]  ;;  %v460_v50 = vadd.f32 %v2097_v20, %v396_v36  ;;  %v2586_v53 = vmul.f32 0.0573, %v2553_v40 }
   0xa   :  { %v940_v24 = vadd.f32 %v2097_v20, %v876_v15  ;;  %v1228_v31 = vadd.f32 %v2525_v26, %v1164_v21  ;;  %v9_v34 = vld [vmem:[%s4254_s0 + $0x8] sm:$0xff]  ;;  %v233_v37 = vmul.f32 0.0265, %v201_v14  ;;  %v942_v57 = vadd.f32 %v2515_v23, %v878_v29  ;;  %v2628_v11 = vld [vmem:[%s4254_s0 + $0x3c] sm:$0xff]  ;;  %v2640_v16 = vld [vmem:[%s4254_s0 + $0x50] sm:$0xff] }
   0xb   :  { %v523_v30 = vadd.f32 %v2504_v19, %v458_v18  ;;  %v73_v41 = vadd.f32 %v41_v35, %v9_v34  ;;  %v266_v42 = vld [vmem:[%s4254_s0 + $0x9] sm:$0xff]  ;;  %v2578_v51 = vld [vmem:[%s4254_s0 + $0x61] sm:$0xff]  ;;  %v1580_v59 = vadd.f32 %v2583_v52, %v1516_v46  ;;  %v525_v63 = vadd.f32 %v2474_v5, %v460_v50  ;;  %v2322_v21 = vld [vmem:[%s4254_s0 + $0x39] sm:$0xff] }
   0xc   :  { %v1004_v38 = vadd.f32 %v2520_v25, %v940_v24  ;;  %v1292_v45 = vadd.f32 %v2538_v32, %v1228_v31  ;;  %v2565_v47 = vld [vmem:[%s4254_s0 + $0x68] sm:$0xff]  ;;  %v1230_v14 = vadd.f32 %v2578_v51, %v2611_v0  ;;  %v1454_v22 = vadd.f32 %v2553_v40, %v2525_v26  ;;  %v2354_v39 = vld [vmem:[%s4254_s0 + $0x3b] sm:$0xff] }
   0xd   :  { %v587_v44 = vadd.f32 %v2515_v23, %v523_v30  ;;  %v298_v48 = vld [vmem:[%s4254_s0 + $0xb] sm:$0xff]  ;;  %v138_v54 = vadd.f32 %v2565_v47, %v73_v41  ;;  %v2616_v1 = vld [vmem:[%s4254_s0 + $0x63] sm:$0xff]  ;;  %v589_v13 = vadd.f32 %v2486_v10, %v525_v63  ;;  %v1612_v27 = vmul.f32 0.052, %v1580_v59  ;;  %v2674_v41 = vld [vmem:[%s4254_s0 + $0x78] sm:$0xff] }
   0xe   :  { %v2592_v55 = vld [vmem:[%s4254_s0 + $0x6c] sm:$0xff]  ;;  %v330_v56 = vadd.f32 %v298_v48, %v266_v42  ;;  %v2600_v60 = vld [vmem:[%s4254_s0 + $0x24] sm:$0xff]  ;;  %v1036_v2 = vmul.f32 0.039, %v1004_v38  ;;  %v1324_v9 = vmul.f32 0.0473, %v1292_v45  ;;  %v2663_v33 = vadd.f32 %v2538_v32, %v2525_v26 }
   0xf   :  { %v651_v58 = vadd.f32 %v2578_v51, %v587_v44  ;;  %v812_v61 = vld [vmem:[%s4254_s0 + $0xa] sm:$0xff]  ;;  %v202_v3 = vadd.f32 %v2592_v55, %v138_v54  ;;  %v2162_v7 = vld [vmem:[%s4254_s0 + $0x21] sm:$0xff]  ;;  %v2679_v26 = vld [vmem:[%s4254_s0 + $0x79] sm:$0xff]  ;;  %v139_v46 = vadd.f32 %v2674_v41, %v2530_v28  ;;  %v1294_v59 = vadd.f32 %v2616_v1, %v1230_v14 }
  0x10   :  { %v395_v4 = vadd.f32 %v2573_v49, %v330_v56  ;;  %v877_v6 = vadd.f32 %v2608_v62, %v812_v61  ;;  %v2194_v12 = vld [vmem:[%s4254_s0 + $0x23] sm:$0xff]  ;;  %v2659_v30 = vld [vmem:[%s4254_s0 + $0x51] sm:$0xff]  ;;  %v653_v48 = vadd.f32 %v2679_v26, %v589_v13  ;;  %v2692_v50 = vld [vmem:[%s4254_s0 + $0x7a] sm:$0xff]  ;;  %v1518_v61 = vadd.f32 %v2538_v32, %v1454_v22 }
  0x11   :  { %v715_v8 = vadd.f32 %v2616_v1, %v651_v58  ;;  %v1165_v18 = vadd.f32 %v2194_v12, %v2162_v7  ;;  %v2290_v20 = vld [vmem:[%s4254_s0 + $0x22] sm:$0xff]  ;;  %v2654_v29 = vld [vmem:[%s4254_s0 + $0x6a] sm:$0xff]  ;;  %v234_v34 = vmul.f32 0.0265, %v202_v3  ;;  %v2684_v44 = vld [vmem:[%s4254_s0 + $0x54] sm:$0xff]  ;;  %v1006_v58 = vadd.f32 %v2692_v50, %v942_v57 }
  0x12   :  { %v459_v15 = vadd.f32 %v2600_v60, %v395_v4  ;;  %v941_v17 = vadd.f32 %v2628_v11, %v877_v6  ;;  %v1453_v31 = vadd.f32 %v2322_v21, %v2290_v20  ;;  %v2703_v56 = vld [vmem:[%s4254_s0 + $0x7c] sm:$0xff]  ;;  %v2716_v3 = vld [vmem:[%s4254_s0 + $0x69] sm:$0xff]  ;;  %v2721_v4 = vld [vmem:[%s4254_s0 + $0x53] sm:$0xff] }
  0x13   :  { %v747_v24 = vmul.f32 0.0354, %v715_v8  ;;  %v1229_v38 = vadd.f32 %v2659_v30, %v1165_v18  ;;  %v2708_v28 = vld [vmem:[%s4254_s0 + $0x7b] sm:$0xff]  ;;  %v2726_v6 = vld [vmem:[%s4254_s0 + $0x52] sm:$0xff]  ;;  %v203_v32 = vadd.f32 %v2703_v56, %v139_v46  ;;  %v75_v46 = vadd.f32 %v2600_v60, %v2573_v49 }
  0x14   :  { %v524_v35 = vadd.f32 %v2640_v16, %v459_v15  ;;  %v1005_v36 = vadd.f32 %v2654_v29, %v941_v17  ;;  %v1517_v45 = vadd.f32 %v2354_v39, %v1453_v31  ;;  %v2737_v8 = vld [vmem:[%s4254_s0 + $0x6b] sm:$0xff] }
  0x15   :  { %v779_v42 = vadd.f32 %v747_v24, %v233_v37  ;;  %v2698_v37 = vld [vmem:[%s4254_s0 + $0x3a] sm:$0xff]  ;;  %v1293_v13 = vadd.f32 %v2721_v4, %v1229_v38  ;;  %v235_v17 = vmul.f32 0.0265, %v203_v32  ;;  %v1038_v24 = vmul.f32 0.039, %v1006_v58 }
  0x16   :  { %v588_v54 = vadd.f32 %v2684_v44, %v524_v35  ;;  %v2729_v57 = vmul.f32 0.0573, %v2698_v37  ;;  %v1037_v12 = vmul.f32 0.039, %v1005_v36  ;;  %v1581_v14 = vadd.f32 %v2726_v6, %v1517_v45  ;;  %v2748_v36 = vld [vmem:[%s4254_s0 + $0x80] sm:$0xff] }
  0x17   :  { %v1068_v63 = vadd.f32 %v1036_v2, %v779_v42  ;;  %v717_v2 = vadd.f32 %v2708_v28, %v653_v48  ;;  %v1326_v35 = vmul.f32 0.0473, %v1294_v59  ;;  %v1582_v42 = vadd.f32 %v2520_v25, %v1518_v61 }
  0x18   :  { %v652_v7 = vadd.f32 %v2716_v3, %v588_v54  ;;  %v879_v38 = vadd.f32 %v2290_v20, %v2640_v16  ;;  %v140_v59 = vadd.f32 %v2748_v36, %v75_v46 }
  0x19   :  { %v1356_v15 = vadd.f32 %v1324_v9, %v1068_v63  ;;  %v749_v22 = vmul.f32 0.0354, %v717_v2  ;;  %v397_v9 = vadd.f32 %v2608_v62, %v1165_v18  ;;  %v1614_v58 = vmul.f32 0.052, %v1582_v42  ;;  %v2759_v18 = vld [vmem:[%s4254_s0 + $0x84] sm:$0xff] }
  0x1a   :  { %v716_v31 = vadd.f32 %v2737_v8, %v652_v7  ;;  %v1167_v63 = vadd.f32 %v2354_v39, %v2322_v21  ;;  %v943_v60 = vadd.f32 %v2684_v44, %v879_v38  ;;  %v1325_v2 = vmul.f32 0.0473, %v1293_v13  ;;  %v2773_v13 = vld [vmem:[%s4254_s0 + $0x82] sm:$0xff]  ;;  %v2799_v38 = vld [vmem:[%s4254_s0 + $0x94] sm:$0xff] }
  0x1b   :  { %v1644_v48 = vadd.f32 %v1612_v27, %v1356_v15  ;;  %v781_v54 = vadd.f32 %v749_v22, %v235_v17  ;;  %v461_v49 = vadd.f32 %v2628_v11, %v397_v9  ;;  %v1455_v7 = vadd.f32 %v2698_v37, %v2659_v30 }
  0x1c   :  { %v748_v45 = vmul.f32 0.0354, %v716_v31  ;;  %v1231_v20 = vadd.f32 %v2716_v3, %v1167_v63  ;;  %v204_v17 = vadd.f32 %v2759_v18, %v140_v59  ;;  %v1007_v22 = vadd.f32 %v2773_v13, %v943_v60  ;;  %v2810_v60 = vld [vmem:[%s4254_s0 + $0x83] sm:$0xff] }
  0x1d   :  { %v1740_v61 = vadd.f32 %v2586_v53, %v1644_v48  ;;  %v1070_v32 = vadd.f32 %v1038_v24, %v781_v54  ;;  %v1613_v53 = vmul.f32 0.052, %v1581_v14  ;;  %v526_v39 = vadd.f32 %v2565_v47, %v461_v49  ;;  %v2781_v14 = vld [vmem:[%s4254_s0 + $0x90] sm:$0xff]  ;;  %v2792_v48 = vld [vmem:[%s4254_s0 + $0x81] sm:$0xff] }
  0x1e   :  { %v780_v27 = vadd.f32 %v748_v45, %v234_v34  ;;  %v1710_v34 = vmul.f32 0.0573, %v2583_v52  ;;  %v1519_v24 = vadd.f32 %v2721_v4, %v1455_v7  ;;  %v2785_v42 = vmul.f32 0.0573, %v2726_v6 }
  0x1f   :  { %1773 = vst.msk [vmem:[%s4255_s1] sm:$0xff] %vm1772_vm0, %v1740_v61  ;;  %v1358_v21 = vadd.f32 %v1326_v35, %v1070_v32  ;;  %v590_v35 = vadd.f32 %v2592_v55, %v526_v39  ;;  %v1295_v54 = vadd.f32 %v2737_v8, %v1231_v20  ;;  %v398_v45 = vadd.f32 %v2504_v19, %v2611_v0 }
  0x20   :  { %v1069_v15 = vadd.f32 %v1037_v12, %v780_v27  ;;  %v141_v12 = vadd.f32 %v2781_v14, %v2558_v43  ;;  %v1583_v9 = vadd.f32 %v2654_v29, %v1519_v24  ;;  %v880_v61 = vadd.f32 %v2553_v40, %v2474_v5 }
  0x21   :  { %v1646_v31 = vadd.f32 %v1614_v58, %v1358_v21  ;;  %v654_v43 = vadd.f32 %v2792_v48, %v590_v35  ;;  %v236_v49 = vmul.f32 0.0265, %v204_v17  ;;  %v462_v27 = vadd.f32 %v2515_v23, %v398_v45 }
  0x22   :  { %v1357_v46 = vadd.f32 %v1325_v2, %v1069_v15  ;;  %v205_v59 = vadd.f32 %v2799_v38, %v141_v12  ;;  %v1232_v0 = vadd.f32 %v2679_v26, %v2663_v33  ;;  %v1039_v40 = vmul.f32 0.039, %v1007_v22  ;;  %v2842_v12 = vld [vmem:[%s4254_s0 + $0x98] sm:$0xff] }
  0x23   :  { %v1742_v58 = vadd.f32 %v1710_v34, %v1646_v31  ;;  %v718_v2 = vadd.f32 %v2810_v60, %v654_v43  ;;  %v944_v20 = vadd.f32 %v2486_v10, %v880_v61  ;;  %v1456_v7 = vadd.f32 %v2583_v52, %v2578_v51 }
  0x24   :  { %v1645_v32 = vadd.f32 %v1613_v53, %v1357_v46  ;;  %v1327_v21 = vmul.f32 0.0473, %v1295_v54  ;;  %v1615_v34 = vmul.f32 0.052, %v1583_v9  ;;  %v527_v39 = vadd.f32 %v2674_v41, %v462_v27  ;;  %v2850_v54 = vld [vmem:[%s4254_s0 + $0x91] sm:$0xff] }
  0x25   :  { %1775 = vst.msk [vmem:[%s4255_s1 + $0x10] sm:$0xff] %vm1772_vm0, %v1742_v58  ;;  %v750_v15 = vmul.f32 0.0354, %v718_v2  ;;  %v237_v17 = vmul.f32 0.0265, %v205_v59  ;;  %v1520_v24 = vadd.f32 %v2616_v1, %v1456_v7  ;;  %v77_v31 = vadd.f32 %v2628_v11, %v2608_v62 }
  0x26   :  { %v1741_v53 = vadd.f32 %v2729_v57, %v1645_v32  ;;  %v591_v22 = vadd.f32 %v2703_v56, %v527_v39  ;;  %v2836_v57 = vld [vmem:[%s4254_s0 + $0x92] sm:$0xff]  ;;  %v1296_v35 = vadd.f32 %v2708_v28, %v1232_v0  ;;  %v399_v62 = vadd.f32 %v2640_v16, %v1167_v63  ;;  %v2859_v63 = vld [vmem:[%s4254_s0 + $0x9c] sm:$0xff] }
  0x27   :  { %v881_v11 = vadd.f32 %v2698_v37, %v2565_v47  ;;  %v782_v46 = vadd.f32 %v750_v15, %v236_v49  ;;  %v1008_v9 = vadd.f32 %v2836_v57, %v944_v20  ;;  %v1584_v45 = vadd.f32 %v2692_v50, %v1520_v24  ;;  %v2868_v49 = vld [vmem:[%s4254_s0 + $0x93] sm:$0xff] }
  0x28   :  { %1774 = vst.msk [vmem:[%s4255_s1 + $0x8] sm:$0xff] %vm1772_vm0, %v1741_v53  ;;  %v142_v58 = vadd.f32 %v2842_v12, %v77_v31  ;;  %v655_v43 = vadd.f32 %v2850_v54, %v591_v22  ;;  %v463_v37 = vadd.f32 %v2684_v44, %v399_v62  ;;  %v1169_v61 = vadd.f32 %v2721_v4, %v2659_v30  ;;  %v2880_v15 = vld [vmem:[%s4254_s0 + $0x9a] sm:$0xff] }
  0x29   :  { %v945_v59 = vadd.f32 %v2592_v55, %v881_v11  ;;  %v1071_v32 = vadd.f32 %v1039_v40, %v782_v46  ;;  %v1712_v27 = vmul.f32 0.0573, %v2520_v25  ;;  %v1457_v2 = vadd.f32 %v2726_v6, %v2716_v3 }
  0x2a   :  { %v206_v0 = vadd.f32 %v2859_v63, %v142_v58  ;;  %v719_v20 = vadd.f32 %v2868_v49, %v655_v43  ;;  %v1328_v7 = vmul.f32 0.0473, %v1296_v35  ;;  %v528_v53 = vadd.f32 %v2748_v36, %v463_v37 }
  0x2b   :  { %v1233_v30 = vadd.f32 %v2792_v48, %v1169_v61  ;;  %v1359_v4 = vadd.f32 %v1327_v21, %v1071_v32  ;;  %v1040_v40 = vmul.f32 0.039, %v1008_v9  ;;  %v1616_v39 = vmul.f32 0.052, %v1584_v45  ;;  %v2888_v21 = vld [vmem:[%s4254_s0 + $0x99] sm:$0xff] }
  0x2c   :  { %v1521_v24 = vadd.f32 %v2737_v8, %v1457_v2  ;;  %v751_v31 = vmul.f32 0.0354, %v719_v20  ;;  %v238_v22 = vmul.f32 0.0265, %v206_v0  ;;  %v592_v62 = vadd.f32 %v2759_v18, %v528_v53 }
  0x2d   :  { %v1009_v35 = vadd.f32 %v2880_v15, %v945_v59  ;;  %v1647_v11 = vadd.f32 %v1615_v34, %v1359_v4  ;;  %v1297_v46 = vadd.f32 %v2810_v60, %v1233_v30  ;;  %v78_v9 = vadd.f32 %v2515_v23, %v2504_v19  ;;  %v2902_v34 = vld [vmem:[%s4254_s0 + $0xa8] sm:$0xff]  ;;  %v2910_v19 = vld [vmem:[%s4254_s0 + $0x9b] sm:$0xff] }
  0x2e   :  { %v400_v45 = vadd.f32 %v2474_v5, %v2663_v33  ;;  %v783_v58 = vadd.f32 %v751_v31, %v237_v17  ;;  %v656_v43 = vadd.f32 %v2888_v21, %v592_v62  ;;  %v2897_v37 = vmul.f32 0.0573, %v2654_v29  ;;  %v2926_v30 = vld [vmem:[%s4254_s0 + $0xac] sm:$0xff] }
  0x2f   :  { %v882_v59 = vadd.f32 %v2583_v52, %v2674_v41  ;;  %v1743_v32 = vadd.f32 %v2785_v42, %v1647_v11  ;;  %v1585_v23 = vadd.f32 %v2773_v13, %v1521_v24  ;;  %v143_v33 = vadd.f32 %v2902_v34, %v78_v9  ;;  %v2937_v11 = vld [vmem:[%s4254_s0 + $0xaa] sm:$0xff] }
  0x30   :  { %v464_v17 = vadd.f32 %v2486_v10, %v400_v45  ;;  %v1072_v0 = vadd.f32 %v1040_v40, %v783_v58  ;;  %v720_v2 = vadd.f32 %v2910_v19, %v656_v43  ;;  %v1170_v52 = vadd.f32 %v2616_v1, %v2578_v51  ;;  %v2945_v58 = vld [vmem:[%s4254_s0 + $0xa9] sm:$0xff] }
  0x31   :  { %v946_v20 = vadd.f32 %v2703_v56, %v882_v59  ;;  %1776 = vst.msk [vmem:[%s4255_s1 + $0x18] sm:$0xff] %vm1772_vm0, %v1743_v32  ;;  %v1041_v42 = vmul.f32 0.039, %v1009_v35  ;;  %v1329_v53 = vmul.f32 0.0473, %v1297_v46  ;;  %v1458_v40 = vadd.f32 %v2520_v25, %v2679_v26  ;;  %v2954_v32 = vld [vmem:[%s4254_s0 + $0xb0] sm:$0xff] }
  0x32   :  { %v529_v4 = vadd.f32 %v2781_v14, %v464_v17  ;;  %v1360_v24 = vadd.f32 %v1328_v7, %v1072_v0  ;;  %v752_v31 = vmul.f32 0.0354, %v720_v2  ;;  %v207_v51 = vadd.f32 %v2926_v30, %v143_v33  ;;  %v2963_v0 = vld [vmem:[%s4254_s0 + $0xab] sm:$0xff]  ;;  %v2968_v2 = vld [vmem:[%s4254_s0 + $0xb4] sm:$0xff] }
  0x33   :  { %v1234_v1 = vadd.f32 %v2850_v54, %v1170_v52  ;;  %v1617_v62 = vmul.f32 0.052, %v1585_v23  ;;  %v1522_v46 = vadd.f32 %v2708_v28, %v1458_v40  ;;  %v79_v9 = vadd.f32 %v2684_v44, %v2640_v16 }
  0x34   :  { %v593_v35 = vadd.f32 %v2799_v38, %v529_v4  ;;  %v1648_v45 = vadd.f32 %v1616_v39, %v1360_v24  ;;  %v784_v7 = vadd.f32 %v752_v31, %v238_v22  ;;  %v1010_v43 = vadd.f32 %v2937_v11, %v946_v20 }
  0x35   :  { %v2949_v59 = vmul.f32 0.0573, %v2692_v50  ;;  %v1298_v16 = vadd.f32 %v2868_v49, %v1234_v1  ;;  %v144_v44 = vadd.f32 %v2954_v32, %v79_v9  ;;  %v401_v39 = vadd.f32 %v2565_v47, %v1169_v61 }
  0x36   :  { %v657_v23 = vadd.f32 %v2945_v58, %v593_v35  ;;  %v1744_v22 = vadd.f32 %v1712_v27, %v1648_v45  ;;  %v1073_v33 = vadd.f32 %v1041_v42, %v784_v7  ;;  %v239_v17 = vmul.f32 0.0265, %v207_v51 }
  0x37   :  { %v883_v20 = vadd.f32 %v2726_v6, %v2748_v36  ;;  %v1586_v61 = vadd.f32 %v2836_v57, %v1522_v46  ;;  %v208_v27 = vadd.f32 %v2968_v2, %v144_v44  ;;  %v465_v42 = vadd.f32 %v2592_v55, %v401_v39  ;;  %v2984_v6 = vld [vmem:[%s4254_s0 + $0xb2] sm:$0xff] }
  0x38   :  { %v721_v4 = vadd.f32 %v2963_v0, %v657_v23  ;;  %1777 = vst.msk [vmem:[%s4255_s1 + $0x20] sm:$0xff] %vm1772_vm0, %v1744_v22  ;;  %v1361_v40 = vadd.f32 %v1329_v53, %v1073_v33  ;;  %v1171_v31 = vadd.f32 %v2737_v8, %v2716_v3  ;;  %v1459_v51 = vadd.f32 %v2654_v29, %v2792_v48 }
  0x39   :  { %v947_v24 = vadd.f32 %v2759_v18, %v883_v20  ;;  %v1042_v35 = vmul.f32 0.039, %v1010_v43  ;;  %v1330_v46 = vmul.f32 0.0473, %v1298_v16  ;;  %v530_v9 = vadd.f32 %v2842_v12, %v465_v42 }
  0x3a   :  { %v753_v1 = vmul.f32 0.0354, %v721_v4  ;;  %v1649_v45 = vadd.f32 %v1617_v62, %v1361_v40  ;;  %v1235_v7 = vadd.f32 %v2888_v21, %v1171_v31  ;;  %v1523_v23 = vadd.f32 %v2810_v60, %v1459_v51  ;;  %v3002_v62 = vld [vmem:[%s4254_s0 + $0xb1] sm:$0xff] }
  0x3b   :  { %v1011_v53 = vadd.f32 %v2984_v6, %v947_v24  ;;  %v594_v39 = vadd.f32 %v2859_v63, %v530_v9  ;;  %v80_v3 = vadd.f32 %v2486_v10, %v2474_v5  ;;  %v402_v8 = vadd.f32 %v2674_v41, %v1170_v52  ;;  %v3020_v52 = vld [vmem:[%s4254_s0 + $0xb3] sm:$0xff] }
  0x3c   :  { %v785_v44 = vadd.f32 %v753_v1, %v239_v17  ;;  %v1745_v43 = vadd.f32 %v2897_v37, %v1649_v45  ;;  %v1618_v16 = vmul.f32 0.052, %v1586_v61  ;;  %v240_v22 = vmul.f32 0.0265, %v208_v27  ;;  %v3008_v17 = vld [vmem:[%s4254_s0 + $0xc0] sm:$0xff] }
  0x3d   :  { %v1299_v33 = vadd.f32 %v2910_v19, %v1235_v7  ;;  %v658_v5 = vadd.f32 %v3002_v62, %v594_v39  ;;  %v145_v10 = vadd.f32 %v3008_v17, %v80_v3  ;;  %v466_v37 = vadd.f32 %v2703_v56, %v402_v8  ;;  %v3032_v1 = vld [vmem:[%s4254_s0 + $0xc4] sm:$0xff] }
  0x3e   :  { %v1074_v20 = vadd.f32 %v1042_v35, %v785_v44  ;;  %1778 = vst.msk [vmem:[%s4255_s1 + $0x28] sm:$0xff] %vm1772_vm0, %v1745_v43  ;;  %v1587_v4 = vadd.f32 %v2880_v15, %v1523_v23  ;;  %v1715_v61 = vmul.f32 0.0573, %v2773_v13  ;;  %v884_v27 = vadd.f32 %v2520_v25, %v2781_v14  ;;  %v3044_v23 = vld [vmem:[%s4254_s0 + $0xc2] sm:$0xff] }
  0x3f   :  { %v1172_v42 = vadd.f32 %v2708_v28, %v2679_v26  ;;  %v722_v24 = vadd.f32 %v3020_v52, %v658_v5  ;;  %v1043_v51 = vmul.f32 0.039, %v1011_v53  ;;  %v531_v35 = vadd.f32 %v2902_v34, %v466_v37  ;;  %v3049_v39 = vld [vmem:[%s4254_s0 + $0xc1] sm:$0xff] }
  0x40   :  { %v1362_v40 = vadd.f32 %v1330_v46, %v1074_v20  ;;  %v209_v9 = vadd.f32 %v3032_v1, %v145_v10  ;;  %v948_v45 = vadd.f32 %v2799_v38, %v884_v27  ;;  %v1460_v26 = vadd.f32 %v2692_v50, %v2850_v54  ;;  %v3060_v5 = vld [vmem:[%s4254_s0 + $0xc8] sm:$0xff] }
  0x41   :  { %v1236_v25 = vadd.f32 %v2945_v58, %v1172_v42  ;;  %v754_v46 = vmul.f32 0.0354, %v722_v24  ;;  %v1331_v7 = vmul.f32 0.0473, %v1299_v33  ;;  %v595_v53 = vadd.f32 %v2926_v30, %v531_v35  ;;  %v3079_v27 = vld [vmem:[%s4254_s0 + $0xcc] sm:$0xff] }
  0x42   :  { %v1650_v28 = vadd.f32 %v1618_v16, %v1362_v40  ;;  %v1619_v44 = vmul.f32 0.052, %v1587_v4  ;;  %v1012_v3 = vadd.f32 %v3044_v23, %v948_v45  ;;  %v1524_v8 = vadd.f32 %v2868_v49, %v1460_v26  ;;  %v3066_v4 = vld [vmem:[%s4254_s0 + $0xc3] sm:$0xff] }
  0x43   :  { %v81_v43 = vadd.f32 %v2592_v55, %v2565_v47  ;;  %v786_v33 = vadd.f32 %v754_v46, %v240_v22  ;;  %v659_v20 = vadd.f32 %v3049_v39, %v595_v53  ;;  %v403_v10 = vadd.f32 %v2748_v36, %v1171_v31 }
  0x44   :  { %v1746_v16 = vadd.f32 %v2949_v59, %v1650_v28  ;;  %v241_v37 = vmul.f32 0.0265, %v209_v9  ;;  %v1300_v47 = vadd.f32 %v2963_v0, %v1236_v25  ;;  %v1588_v55 = vadd.f32 %v2937_v11, %v1524_v8 }
  0x45   :  { %v146_v59 = vadd.f32 %v3060_v5, %v81_v43  ;;  %v1075_v22 = vadd.f32 %v1043_v51, %v786_v33  ;;  %v723_v31 = vadd.f32 %v3066_v4, %v659_v20  ;;  %v467_v40 = vadd.f32 %v2759_v18, %v403_v10  ;;  %v3103_v20 = vld [vmem:[%s4254_s0 + $0xc9] sm:$0xff] }
  0x46   :  { %1779 = vst.msk [vmem:[%s4255_s1 + $0x30] sm:$0xff] %vm1772_vm0, %v1746_v16  ;;  %v885_v24 = vadd.f32 %v2654_v29, %v2842_v12  ;;  %v1044_v35 = vmul.f32 0.039, %v1012_v3  ;;  %v1173_v45 = vadd.f32 %v2810_v60, %v2792_v48  ;;  %v1461_v51 = vadd.f32 %v2773_v13, %v2888_v21  ;;  %v3098_v60 = vld [vmem:[%s4254_s0 + $0xca] sm:$0xff] }
  0x47   :  { %v210_v9 = vadd.f32 %v3079_v27, %v146_v59  ;;  %v1363_v25 = vadd.f32 %v1331_v7, %v1075_v22  ;;  %v755_v26 = vmul.f32 0.0354, %v723_v31  ;;  %v532_v28 = vadd.f32 %v2954_v32, %v467_v40  ;;  %v3116_v31 = vld [vmem:[%s4254_s0 + $0xd8] sm:$0xff]  ;;  %v3121_v40 = vld [vmem:[%s4254_s0 + $0xcb] sm:$0xff] }
  0x48   :  { %v949_v46 = vadd.f32 %v2859_v63, %v885_v24  ;;  %v1332_v53 = vmul.f32 0.0473, %v1300_v47  ;;  %v1716_v8 = vmul.f32 0.0573, %v2836_v57  ;;  %v1237_v29 = vadd.f32 %v3002_v62, %v1173_v45 }
  0x49   :  { %v1525_v3 = vadd.f32 %v2910_v19, %v1461_v51  ;;  %v1651_v43 = vadd.f32 %v1619_v44, %v1363_v25  ;;  %v787_v16 = vadd.f32 %v755_v26, %v241_v37  ;;  %v1620_v33 = vmul.f32 0.052, %v1588_v55 }
  0x4a   :  { %v596_v48 = vadd.f32 %v2968_v2, %v532_v28  ;;  %v242_v7 = vmul.f32 0.0265, %v210_v9  ;;  %v1013_v10 = vadd.f32 %v3098_v60, %v949_v46  ;;  %v82_v44 = vadd.f32 %v2703_v56, %v2674_v41  ;;  %v3135_v9 = vld [vmem:[%s4254_s0 + $0xdc] sm:$0xff] }
  0x4b   :  { %v404_v37 = vadd.f32 %v2781_v14, %v1172_v42  ;;  %v1747_v47 = vadd.f32 %v1715_v61, %v1651_v43  ;;  %v1076_v55 = vadd.f32 %v1044_v35, %v787_v16  ;;  %v3111_v22 = vmul.f32 0.0573, %v2880_v15 }
  0x4c   :  { %v660_v59 = vadd.f32 %v3103_v20, %v596_v48  ;;  %v1301_v41 = vadd.f32 %v3020_v52, %v1237_v29  ;;  %v1589_v56 = vadd.f32 %v2984_v6, %v1525_v3  ;;  %v147_v61 = vadd.f32 %v3116_v31, %v82_v44 }
  0x4d   :  { %v468_v42 = vadd.f32 %v2799_v38, %v404_v37  ;;  %1780 = vst.msk [vmem:[%s4255_s1 + $0x38] sm:$0xff] %vm1772_vm0, %v1747_v47  ;;  %v1364_v24 = vadd.f32 %v1332_v53, %v1076_v55  ;;  %v886_v51 = vadd.f32 %v2692_v50, %v2902_v34  ;;  %v1174_v25 = vadd.f32 %v2868_v49, %v2850_v54  ;;  %v3151_v54 = vld [vmem:[%s4254_s0 + $0xda] sm:$0xff] }
  0x4e   :  { %v724_v35 = vadd.f32 %v3121_v40, %v660_v59  ;;  %v1045_v26 = vmul.f32 0.039, %v1013_v10  ;;  %v211_v28 = vadd.f32 %v3135_v9, %v147_v61  ;;  %v1462_v53 = vadd.f32 %v2836_v57, %v2945_v58  ;;  %v3159_v47 = vld [vmem:[%s4254_s0 + $0xd9] sm:$0xff] }
  0x4f   :  { %v533_v46 = vadd.f32 %v3008_v17, %v468_v42  ;;  %v1652_v29 = vadd.f32 %v1620_v33, %v1364_v24  ;;  %v950_v43 = vadd.f32 %v2926_v30, %v886_v51  ;;  %v1238_v16 = vadd.f32 %v3049_v39, %v1174_v25  ;;  %v3165_v59 = vld [vmem:[%s4254_s0 + $0xe0] sm:$0xff] }
  0x50   :  { %v756_v3 = vmul.f32 0.0354, %v724_v35  ;;  %v1333_v48 = vmul.f32 0.0473, %v1301_v41  ;;  %v1526_v49 = vadd.f32 %v2963_v0, %v1462_v53  ;;  %v83_v10 = vadd.f32 %v2759_v18, %v2748_v36  ;;  %v3171_v36 = vld [vmem:[%s4254_s0 + $0xdb] sm:$0xff]  ;;  %v3184_v24 = vld [vmem:[%s4254_s0 + $0xe4] sm:$0xff] }
  0x51   :  { %v597_v50 = vadd.f32 %v3032_v1, %v533_v46  ;;  %v1748_v44 = vadd.f32 %v1716_v8, %v1652_v29  ;;  %v1621_v37 = vmul.f32 0.052, %v1589_v56  ;;  %v1014_v55 = vadd.f32 %v3151_v54, %v950_v43  ;;  %v3196_v29 = vld [vmem:[%s4254_s0 + $0xe2] sm:$0xff] }
  0x52   :  { %v788_v33 = vadd.f32 %v756_v3, %v242_v7  ;;  %v1302_v18 = vadd.f32 %v3066_v4, %v1238_v16  ;;  %v148_v8 = vadd.f32 %v3165_v59, %v83_v10  ;;  %v405_v7 = vadd.f32 %v2842_v12, %v1173_v45 }
  0x53   :  { %v661_v41 = vadd.f32 %v3159_v47, %v597_v50  ;;  %1781 = vst.msk [vmem:[%s4255_s1 + $0x40] sm:$0xff] %vm1772_vm0, %v1748_v44  ;;  %v243_v61 = vmul.f32 0.0265, %v211_v28  ;;  %v1718_v42 = vmul.f32 0.0573, %v2937_v11  ;;  %v887_v35 = vadd.f32 %v2773_v13, %v2954_v32 }
  0x54   :  { %v1077_v56 = vadd.f32 %v1045_v26, %v788_v33  ;;  %v1590_v45 = vadd.f32 %v3044_v23, %v1526_v49  ;;  %v212_v46 = vadd.f32 %v3184_v24, %v148_v8  ;;  %v469_v53 = vadd.f32 %v2859_v63, %v405_v7 }
  0x55   :  { %v725_v51 = vadd.f32 %v3171_v36, %v661_v41  ;;  %v951_v28 = vadd.f32 %v2968_v2, %v887_v35  ;;  %v1175_v3 = vadd.f32 %v2910_v19, %v2888_v21  ;;  %v1463_v13 = vadd.f32 %v2880_v15, %v3002_v62 }
  0x56   :  { %v1365_v26 = vadd.f32 %v1333_v48, %v1077_v56  ;;  %v1046_v16 = vmul.f32 0.039, %v1014_v55  ;;  %v1334_v50 = vmul.f32 0.0473, %v1302_v18  ;;  %v534_v49 = vadd.f32 %v3060_v5, %v469_v53 }
  0x57   :  { %v757_v43 = vmul.f32 0.0354, %v725_v51  ;;  %v1015_v48 = vadd.f32 %v3196_v29, %v951_v28  ;;  %v1239_v44 = vadd.f32 %v3103_v20, %v1175_v3  ;;  %v1527_v33 = vadd.f32 %v3020_v52, %v1463_v13 }
  0x58   :  { %v1653_v10 = vadd.f32 %v1621_v37, %v1365_v26  ;;  %v598_v8 = vadd.f32 %v3079_v27, %v534_v49  ;;  %v84_v21 = vadd.f32 %v2799_v38, %v2781_v14  ;;  %v406_v19 = vadd.f32 %v2902_v34, %v1174_v25  ;;  %v3214_v37 = vld [vmem:[%s4254_s0 + $0xe1] sm:$0xff] }
  0x59   :  { %v789_v41 = vadd.f32 %v757_v43, %v243_v61  ;;  %v1622_v18 = vmul.f32 0.052, %v1590_v45  ;;  %v244_v7 = vmul.f32 0.0265, %v212_v46  ;;  %v1303_v56 = vadd.f32 %v3121_v40, %v1239_v44  ;;  %v3220_v61 = vld [vmem:[%s4254_s0 + $0xf0] sm:$0xff]  ;;  %v3232_v25 = vld [vmem:[%s4254_s0 + $0xe3] sm:$0xff] }
  0x5a   :  { %v1749_v55 = vadd.f32 %v3111_v22, %v1653_v10  ;;  %v662_v14 = vadd.f32 %v3214_v37, %v598_v8  ;;  %v149_v38 = vadd.f32 %v3220_v61, %v84_v21  ;;  %v470_v22 = vadd.f32 %v2926_v30, %v406_v19  ;;  %v3244_v43 = vld [vmem:[%s4254_s0 + $0xf4] sm:$0xff] }
  0x5b   :  { %v1078_v35 = vadd.f32 %v1046_v16, %v789_v41  ;;  %v1591_v51 = vadd.f32 %v3098_v60, %v1527_v33  ;;  %v1719_v45 = vmul.f32 0.0573, %v2984_v6  ;;  %v888_v46 = vadd.f32 %v2836_v57, %v3008_v17  ;;  %v3256_v33 = vld [vmem:[%s4254_s0 + $0xf2] sm:$0xff] }
  0x5c   :  { %1782 = vst.msk [vmem:[%s4255_s1 + $0x48] sm:$0xff] %vm1772_vm0, %v1749_v55  ;;  %v1176_v53 = vadd.f32 %v2963_v0, %v2945_v58  ;;  %v726_v28 = vadd.f32 %v3232_v25, %v662_v14  ;;  %v1047_v13 = vmul.f32 0.039, %v1015_v48  ;;  %v535_v16 = vadd.f32 %v3116_v31, %v470_v22  ;;  %v3261_v8 = vld [vmem:[%s4254_s0 + $0xf1] sm:$0xff] }
  0x5d   :  { %v1366_v26 = vadd.f32 %v1334_v50, %v1078_v35  ;;  %v213_v49 = vadd.f32 %v3244_v43, %v149_v38  ;;  %v952_v10 = vadd.f32 %v3032_v1, %v888_v46  ;;  %v1464_v58 = vadd.f32 %v2937_v11, %v3049_v39  ;;  %v3271_v14 = vld [vmem:[%s4254_s0 + $0xf8] sm:$0xff] }
  0x5e   :  { %v1240_v57 = vadd.f32 %v3159_v47, %v1176_v53  ;;  %v758_v50 = vmul.f32 0.0354, %v726_v28  ;;  %v1335_v44 = vmul.f32 0.0473, %v1303_v56  ;;  %v599_v48 = vadd.f32 %v3135_v9, %v535_v16 }
  0x5f   :  { %v1654_v0 = vadd.f32 %v1622_v18, %v1366_v26  ;;  %v1623_v41 = vmul.f32 0.052, %v1591_v51  ;;  %v1016_v21 = vadd.f32 %v3256_v33, %v952_v10  ;;  %v1528_v19 = vadd.f32 %v3066_v4, %v1464_v58  ;;  %v3277_v51 = vld [vmem:[%s4254_s0 + $0xf3] sm:$0xff] }
  0x60   :  { %v85_v55 = vadd.f32 %v2859_v63, %v2842_v12  ;;  %v790_v56 = vadd.f32 %v758_v50, %v244_v7  ;;  %v663_v35 = vadd.f32 %v3261_v8, %v599_v48  ;;  %v407_v38 = vadd.f32 %v2954_v32, %v1175_v3  ;;  %v3290_v7 = vld [vmem:[%s4254_s0 + $0xfc] sm:$0xff] }
  0x61   :  { %v1750_v18 = vadd.f32 %v1718_v42, %v1654_v0  ;;  %v245_v22 = vmul.f32 0.0265, %v213_v49  ;;  %v1304_v46 = vadd.f32 %v3171_v36, %v1240_v57  ;;  %v1592_v12 = vadd.f32 %v3151_v54, %v1528_v19 }
  0x62   :  { %v150_v63 = vadd.f32 %v3271_v14, %v85_v55  ;;  %v1079_v42 = vadd.f32 %v1047_v13, %v790_v56  ;;  %v727_v3 = vadd.f32 %v3277_v51, %v663_v35  ;;  %v471_v26 = vadd.f32 %v2968_v2, %v407_v38  ;;  %v3314_v35 = vld [vmem:[%s4254_s0 + $0xf9] sm:$0xff] }
  0x63   :  { %1783 = vst.msk [vmem:[%s4255_s1 + $0x50] sm:$0xff] %vm1772_vm0, %v1750_v18  ;;  %v889_v28 = vadd.f32 %v2880_v15, %v3060_v5  ;;  %v1048_v16 = vmul.f32 0.039, %v1016_v21  ;;  %v1177_v10 = vadd.f32 %v3020_v52, %v3002_v62  ;;  %v1465_v13 = vadd.f32 %v2984_v6, %v3103_v20  ;;  %v3309_v52 = vld [vmem:[%s4254_s0 + $0xfa] sm:$0xff] }
  0x64   :  { %v214_v49 = vadd.f32 %v3290_v7, %v150_v63  ;;  %v1367_v57 = vadd.f32 %v1335_v44, %v1079_v42  ;;  %v759_v58 = vmul.f32 0.0354, %v727_v3  ;;  %v536_v0 = vadd.f32 %v3165_v59, %v471_v26  ;;  %v3327_v3 = vld [vmem:[%s4254_s0 + $0x108] sm:$0xff]  ;;  %v3332_v26 = vld [vmem:[%s4254_s0 + $0xfb] sm:$0xff] }
  0x65   :  { %v953_v50 = vadd.f32 %v3079_v27, %v889_v28  ;;  %v1336_v48 = vmul.f32 0.0473, %v1304_v46  ;;  %v1720_v19 = vmul.f32 0.0573, %v3044_v23  ;;  %v1241_v15 = vadd.f32 %v3214_v37, %v1177_v10 }
  0x66   :  { %v1529_v21 = vadd.f32 %v3121_v40, %v1465_v13  ;;  %v1655_v55 = vadd.f32 %v1623_v41, %v1367_v57  ;;  %v791_v18 = vadd.f32 %v759_v58, %v245_v22  ;;  %v1624_v56 = vmul.f32 0.052, %v1592_v12 }
  0x67   :  { %v600_v62 = vadd.f32 %v3184_v24, %v536_v0  ;;  %v246_v44 = vmul.f32 0.0265, %v214_v49  ;;  %v1017_v38 = vadd.f32 %v3309_v52, %v953_v50  ;;  %v86_v41 = vadd.f32 %v2926_v30, %v2902_v34  ;;  %v3346_v49 = vld [vmem:[%s4254_s0 + $0x10c] sm:$0xff] }
  0x68   :  { %v408_v22 = vadd.f32 %v3008_v17, %v1176_v53  ;;  %v1751_v46 = vadd.f32 %v1719_v45, %v1655_v55  ;;  %v1080_v12 = vadd.f32 %v1048_v16, %v791_v18  ;;  %v3322_v42 = vmul.f32 0.0573, %v3098_v60 }
  0x69   :  { %v664_v63 = vadd.f32 %v3314_v35, %v600_v62  ;;  %v1305_v34 = vadd.f32 %v3232_v25, %v1241_v15  ;;  %v1593_v30 = vadd.f32 %v3196_v29, %v1529_v21  ;;  %v151_v45 = vadd.f32 %v3327_v3, %v86_v41 }
  0x6a   :  { %v472_v53 = vadd.f32 %v3032_v1, %v408_v22  ;;  %1784 = vst.msk [vmem:[%s4255_s1 + $0x58] sm:$0xff] %vm1772_vm0, %v1751_v46  ;;  %v1368_v28 = vadd.f32 %v1336_v48, %v1080_v12  ;;  %v890_v13 = vadd.f32 %v2937_v11, %v3116_v31  ;;  %v1178_v57 = vadd.f32 %v3066_v4, %v3049_v39  ;;  %v3362_v39 = vld [vmem:[%s4254_s0 + $0x10a] sm:$0xff] }
  0x6b   :  { %v728_v16 = vadd.f32 %v3332_v26, %v664_v63  ;;  %v1049_v58 = vmul.f32 0.039, %v1017_v38  ;;  %v215_v0 = vadd.f32 %v3346_v49, %v151_v45  ;;  %v1466_v48 = vadd.f32 %v3044_v23, %v3159_v47  ;;  %v3370_v46 = vld [vmem:[%s4254_s0 + $0x109] sm:$0xff] }
  0x6c   :  { %v537_v50 = vadd.f32 %v3220_v61, %v472_v53  ;;  %v1656_v15 = vadd.f32 %v1624_v56, %v1368_v28  ;;  %v954_v55 = vadd.f32 %v3135_v9, %v890_v13  ;;  %v1242_v18 = vadd.f32 %v3261_v8, %v1178_v57  ;;  %v3376_v63 = vld [vmem:[%s4254_s0 + $0x110] sm:$0xff] }
  0x6d   :  { %v760_v21 = vmul.f32 0.0354, %v728_v16  ;;  %v1337_v62 = vmul.f32 0.0473, %v1305_v34  ;;  %v1530_v4 = vadd.f32 %v3171_v36, %v1466_v48  ;;  %v87_v38 = vadd.f32 %v2968_v2, %v2954_v32  ;;  %v3382_v32 = vld [vmem:[%s4254_s0 + $0x10b] sm:$0xff]  ;;  %v3395_v28 = vld [vmem:[%s4254_s0 + $0x114] sm:$0xff] }
  0x6e   :  { %v601_v11 = vadd.f32 %v3244_v43, %v537_v50  ;;  %v1752_v41 = vadd.f32 %v1720_v19, %v1656_v15  ;;  %v1625_v22 = vmul.f32 0.052, %v1593_v30  ;;  %v1018_v12 = vadd.f32 %v3362_v39, %v954_v55  ;;  %v3407_v15 = vld [vmem:[%s4254_s0 + $0x112] sm:$0xff] }
  0x6f   :  { %v792_v56 = vadd.f32 %v760_v21, %v246_v44  ;;  %v1306_v2 = vadd.f32 %v3277_v51, %v1242_v18  ;;  %v152_v19 = vadd.f32 %v3376_v63, %v87_v38  ;;  %v409_v44 = vadd.f32 %v3060_v5, %v1177_v10 }
  0x70   :  { %v665_v34 = vadd.f32 %v3370_v46, %v601_v11  ;;  %1785 = vst.msk [vmem:[%s4255_s1 + $0x60] sm:$0xff] %vm1772_vm0, %v1752_v41  ;;  %v247_v45 = vmul.f32 0.0265, %v215_v0  ;;  %v1722_v53 = vmul.f32 0.0573, %v3151_v54  ;;  %v891_v16 = vadd.f32 %v2984_v6, %v3165_v59 }
  0x71   :  { %v1081_v30 = vadd.f32 %v1049_v58, %v792_v56  ;;  %v1594_v10 = vadd.f32 %v3256_v33, %v1530_v4  ;;  %v216_v50 = vadd.f32 %v3395_v28, %v152_v19  ;;  %v473_v48 = vadd.f32 %v3079_v27, %v409_v44 }
  0x72   :  { %v729_v13 = vadd.f32 %v3382_v32, %v665_v34  ;;  %v955_v0 = vadd.f32 %v3184_v24, %v891_v16  ;;  %v1179_v21 = vadd.f32 %v3121_v40, %v3103_v20  ;;  %v1467_v6 = vadd.f32 %v3098_v60, %v3214_v37 }
  0x73   :  { %v1369_v58 = vadd.f32 %v1337_v62, %v1081_v30  ;;  %v1050_v18 = vmul.f32 0.039, %v1018_v12  ;;  %v1338_v11 = vmul.f32 0.0473, %v1306_v2  ;;  %v538_v4 = vadd.f32 %v3271_v14, %v473_v48 }
  0x74   :  { %v761_v55 = vmul.f32 0.0354, %v729_v13  ;;  %v1019_v62 = vadd.f32 %v3407_v15, %v955_v0  ;;  %v1243_v41 = vadd.f32 %v3314_v35, %v1179_v21  ;;  %v1531_v56 = vadd.f32 %v3232_v25, %v1467_v6 }
  0x75   :  { %v1657_v38 = vadd.f32 %v1625_v22, %v1369_v58  ;;  %v602_v19 = vadd.f32 %v3290_v7, %v538_v4  ;;  %v88_v20 = vadd.f32 %v3032_v1, %v3008_v17  ;;  %v410_v40 = vadd.f32 %v3116_v31, %v1178_v57  ;;  %v3425_v22 = vld [vmem:[%s4254_s0 + $0x111] sm:$0xff] }
  0x76   :  { %v793_v34 = vadd.f32 %v761_v55, %v247_v45  ;;  %v1626_v2 = vmul.f32 0.052, %v1594_v10  ;;  %v248_v44 = vmul.f32 0.0265, %v216_v50  ;;  %v1307_v30 = vadd.f32 %v3332_v26, %v1243_v41  ;;  %v3431_v45 = vld [vmem:[%s4254_s0 + $0x120] sm:$0xff]  ;;  %v3443_v57 = vld [vmem:[%s4254_s0 + $0x113] sm:$0xff] }
  0x77   :  { %v1753_v12 = vadd.f32 %v3322_v42, %v1657_v38  ;;  %v666_v17 = vadd.f32 %v3425_v22, %v602_v19  ;;  %v153_v1 = vadd.f32 %v3431_v45, %v88_v20  ;;  %v474_v42 = vadd.f32 %v3135_v9, %v410_v40  ;;  %v3455_v55 = vld [vmem:[%s4254_s0 + $0x124] sm:$0xff] }
  0x78   :  { %v1082_v16 = vadd.f32 %v1050_v18, %v793_v34  ;;  %v1595_v13 = vadd.f32 %v3309_v52, %v1531_v56  ;;  %v1723_v10 = vmul.f32 0.0573, %v3196_v29  ;;  %v892_v50 = vadd.f32 %v3044_v23, %v3220_v61  ;;  %v3467_v56 = vld [vmem:[%s4254_s0 + $0x122] sm:$0xff] }
  0x79   :  { %1786 = vst.msk [vmem:[%s4255_s1 + $0x68] sm:$0xff] %vm1772_vm0, %v1753_v12  ;;  %v1180_v48 = vadd.f32 %v3171_v36, %v3159_v47  ;;  %v730_v0 = vadd.f32 %v3443_v57, %v666_v17  ;;  %v1051_v6 = vmul.f32 0.039, %v1019_v62  ;;  %v539_v18 = vadd.f32 %v3327_v3, %v474_v42  ;;  %v3472_v19 = vld [vmem:[%s4254_s0 + $0x121] sm:$0xff] }
  0x7a   :  { %v1370_v58 = vadd.f32 %v1338_v11, %v1082_v16  ;;  %v217_v4 = vadd.f32 %v3455_v55, %v153_v1  ;;  %v956_v38 = vadd.f32 %v3244_v43, %v892_v50  ;;  %v1468_v47 = vadd.f32 %v3151_v54, %v3261_v8  ;;  %v3482_v17 = vld [vmem:[%s4254_s0 + $0x128] sm:$0xff] }
  0x7b   :  { %v1244_v23 = vadd.f32 %v3370_v46, %v1180_v48  ;;  %v762_v11 = vmul.f32 0.0354, %v730_v0  ;;  %v1339_v41 = vmul.f32 0.0473, %v1307_v30  ;;  %v603_v62 = vadd.f32 %v3346_v49, %v539_v18 }
  0x7c   :  { %v1658_v36 = vadd.f32 %v1626_v2, %v1370_v58  ;;  %v1627_v34 = vmul.f32 0.052, %v1595_v13  ;;  %v1020_v20 = vadd.f32 %v3467_v56, %v956_v38  ;;  %v1532_v40 = vadd.f32 %v3277_v51, %v1468_v47  ;;  %v3488_v13 = vld [vmem:[%s4254_s0 + $0x123] sm:$0xff] }
  0x7d   :  { %v89_v12 = vadd.f32 %v3079_v27, %v3060_v5  ;;  %v794_v30 = vadd.f32 %v762_v11, %v248_v44  ;;  %v667_v16 = vadd.f32 %v3472_v19, %v603_v62  ;;  %v411_v1 = vadd.f32 %v3165_v59, %v1179_v21  ;;  %v3501_v44 = vld [vmem:[%s4254_s0 + $0x12c] sm:$0xff] }
  0x7e   :  { %v1754_v2 = vadd.f32 %v1722_v53, %v1658_v36  ;;  %v249_v42 = vmul.f32 0.0265, %v217_v4  ;;  %v1308_v50 = vadd.f32 %v3382_v32, %v1244_v23  ;;  %v1596_v5 = vadd.f32 %v3362_v39, %v1532_v40 }
  0x7f   :  { %v154_v27 = vadd.f32 %v3482_v17, %v89_v12  ;;  %v1083_v53 = vadd.f32 %v1051_v6, %v794_v30  ;;  %v731_v21 = vadd.f32 %v3488_v13, %v667_v16  ;;  %v475_v58 = vadd.f32 %v3184_v24, %v411_v1  ;;  %v3525_v16 = vld [vmem:[%s4254_s0 + $0x129] sm:$0xff] }
  0x80   :  { %1787 = vst.msk [vmem:[%s4255_s1 + $0x70] sm:$0xff] %vm1772_vm0, %v1754_v2  ;;  %v893_v0 = vadd.f32 %v3098_v60, %v3271_v14  ;;  %v1052_v18 = vmul.f32 0.039, %v1020_v20  ;;  %v1181_v38 = vadd.f32 %v3232_v25, %v3214_v37  ;;  %v1469_v6 = vadd.f32 %v3196_v29, %v3314_v35  ;;  %v3520_v25 = vld [vmem:[%s4254_s0 + $0x12a] sm:$0xff] }
  0x81   :  { %v218_v4 = vadd.f32 %v3501_v44, %v154_v27  ;;  %v1371_v23 = vadd.f32 %v1339_v41, %v1083_v53  ;;  %v763_v47 = vmul.f32 0.0354, %v731_v21  ;;  %v540_v36 = vadd.f32 %v3376_v63, %v475_v58  ;;  %v3538_v21 = vld [vmem:[%s4254_s0 + $0x138] sm:$0xff]  ;;  %v3543_v58 = vld [vmem:[%s4254_s0 + $0x12b] sm:$0xff] }
  0x82   :  { %v957_v11 = vadd.f32 %v3290_v7, %v893_v0  ;;  %v1340_v62 = vmul.f32 0.0473, %v1308_v50  ;;  %v1724_v40 = vmul.f32 0.0573, %v3256_v33  ;;  %v1245_v60 = vadd.f32 %v3425_v22, %v1181_v38 }
  0x83   :  { %v1533_v20 = vadd.f32 %v3332_v26, %v1469_v6  ;;  %v1659_v12 = vadd.f32 %v1627_v34, %v1371_v23  ;;  %v795_v2 = vadd.f32 %v763_v47, %v249_v42  ;;  %v1628_v30 = vmul.f32 0.052, %v1596_v5 }
  0x84   :  { %v604_v37 = vadd.f32 %v3395_v28, %v540_v36  ;;  %v250_v41 = vmul.f32 0.0265, %v218_v4  ;;  %v1021_v1 = vadd.f32 %v3520_v25, %v957_v11  ;;  %v90_v34 = vadd.f32 %v3135_v9, %v3116_v31  ;;  %v3557_v4 = vld [vmem:[%s4254_s0 + $0x13c] sm:$0xff] }
  0x85   :  { %v412_v42 = vadd.f32 %v3220_v61, %v1180_v48  ;;  %v1755_v50 = vadd.f32 %v1723_v10, %v1659_v12  ;;  %v1084_v5 = vadd.f32 %v1052_v18, %v795_v2  ;;  %v3533_v53 = vmul.f32 0.0573, %v3309_v52 }
  0x86   :  { %v668_v27 = vadd.f32 %v3525_v16, %v604_v37  ;;  %v1309_v31 = vadd.f32 %v3443_v57, %v1245_v60  ;;  %v1597_v9 = vadd.f32 %v3407_v15, %v1533_v20  ;;  %v155_v10 = vadd.f32 %v3538_v21, %v90_v34 }
  0x87   :  { %v476_v48 = vadd.f32 %v3244_v43, %v412_v42  ;;  %1788 = vst.msk [vmem:[%s4255_s1 + $0x78] sm:$0xff] %vm1772_vm0, %v1755_v50  ;;  %v1372_v0 = vadd.f32 %v1340_v62, %v1084_v5  ;;  %v894_v6 = vadd.f32 %v3151_v54, %v3327_v3  ;;  %v1182_v23 = vadd.f32 %v3277_v51, %v3261_v8  ;;  %v3573_v8 = vld [vmem:[%s4254_s0 + $0x13a] sm:$0xff] }
  0x88   :  { %v732_v18 = vadd.f32 %v3543_v58, %v668_v27  ;;  %v1053_v47 = vmul.f32 0.039, %v1021_v1  ;;  %v219_v36 = vadd.f32 %v3557_v4, %v155_v10  ;;  %v1470_v62 = vadd.f32 %v3256_v33, %v3370_v46  ;;  %v3581_v50 = vld [vmem:[%s4254_s0 + $0x139] sm:$0xff] }
  0x89   :  { %v541_v11 = vadd.f32 %v3431_v45, %v476_v48  ;;  %v1660_v60 = vadd.f32 %v1628_v30, %v1372_v0  ;;  %v958_v12 = vadd.f32 %v3346_v49, %v894_v6  ;;  %v1246_v2 = vadd.f32 %v3472_v19, %v1182_v23  ;;  %v3587_v27 = vld [vmem:[%s4254_s0 + $0x140] sm:$0xff] }
  0x8a   :  { %v764_v20 = vmul.f32 0.0354, %v732_v18  ;;  %v1341_v37 = vmul.f32 0.0473, %v1309_v31  ;;  %v1534_v51 = vadd.f32 %v3382_v32, %v1470_v62  ;;  %v91_v1 = vadd.f32 %v3184_v24, %v3165_v59  ;;  %v3593_v59 = vld [vmem:[%s4254_s0 + $0x13b] sm:$0xff]  ;;  %v3606_v0 = vld [vmem:[%s4254_s0 + $0x144] sm:$0xff] }
  0x8b   :  { %v605_v54 = vadd.f32 %v3455_v55, %v541_v11  ;;  %v1756_v34 = vadd.f32 %v1724_v40, %v1660_v60  ;;  %v1629_v42 = vmul.f32 0.052, %v1597_v9  ;;  %v1022_v5 = vadd.f32 %v3573_v8, %v958_v12  ;;  %v3618_v60 = vld [vmem:[%s4254_s0 + $0x142] sm:$0xff] }
  0x8c   :  { %v796_v30 = vadd.f32 %v764_v20, %v250_v41  ;;  %v1310_v24 = vadd.f32 %v3488_v13, %v1246_v2  ;;  %v156_v40 = vadd.f32 %v3587_v27, %v91_v1  ;;  %v413_v41 = vadd.f32 %v3271_v14, %v1181_v38 }
  0x8d   :  { %v669_v31 = vadd.f32 %v3581_v50, %v605_v54  ;;  %1789 = vst.msk [vmem:[%s4255_s1 + $0x80] sm:$0xff] %vm1772_vm0, %v1756_v34  ;;  %v251_v10 = vmul.f32 0.0265, %v219_v36  ;;  %v1726_v48 = vmul.f32 0.0573, %v3362_v39  ;;  %v895_v18 = vadd.f32 %v3196_v29, %v3376_v63 }
  0x8e   :  { %v1085_v9 = vadd.f32 %v1053_v47, %v796_v30  ;;  %v1598_v38 = vadd.f32 %v3467_v56, %v1534_v51  ;;  %v220_v11 = vadd.f32 %v3606_v0, %v156_v40  ;;  %v477_v62 = vadd.f32 %v3290_v7, %v413_v41 }
  0x8f   :  { %v733_v6 = vadd.f32 %v3593_v59, %v669_v31  ;;  %v959_v36 = vadd.f32 %v3395_v28, %v895_v18  ;;  %v1183_v20 = vadd.f32 %v3332_v26, %v3314_v35  ;;  %v1471_v29 = vadd.f32 %v3309_v52, %v3425_v22 }
  0x90   :  { %v1373_v47 = vadd.f32 %v1341_v37, %v1085_v9  ;;  %v1054_v2 = vmul.f32 0.039, %v1022_v5  ;;  %v1342_v54 = vmul.f32 0.0473, %v1310_v24  ;;  %v542_v51 = vadd.f32 %v3482_v17, %v477_v62 }
  0x91   :  { %v765_v12 = vmul.f32 0.0354, %v733_v6  ;;  %v1023_v37 = vadd.f32 %v3618_v60, %v959_v36  ;;  %v1247_v34 = vadd.f32 %v3525_v16, %v1183_v20  ;;  %v1535_v30 = vadd.f32 %v3443_v57, %v1471_v29 }
  0x92   :  { %v1661_v1 = vadd.f32 %v1629_v42, %v1373_v47  ;;  %v606_v40 = vadd.f32 %v3501_v44, %v542_v51  ;;  %v92_v35 = vadd.f32 %v3244_v43, %v3220_v61  ;;  %v414_v26 = vadd.f32 %v3327_v3, %v1182_v23  ;;  %v3636_v42 = vld [vmem:[%s4254_s0 + $0x141] sm:$0xff] }
  0x93   :  { %v797_v31 = vadd.f32 %v765_v12, %v251_v10  ;;  %v1630_v24 = vmul.f32 0.052, %v1598_v38  ;;  %v252_v41 = vmul.f32 0.0265, %v220_v11  ;;  %v1311_v9 = vadd.f32 %v3543_v58, %v1247_v34  ;;  %v3642_v10 = vld [vmem:[%s4254_s0 + $0x150] sm:$0xff]  ;;  %v3654_v23 = vld [vmem:[%s4254_s0 + $0x143] sm:$0xff] }
  0x94   :  { %v1757_v5 = vadd.f32 %v3533_v53, %v1661_v1  ;;  %v670_v61 = vadd.f32 %v3636_v42, %v606_v40  ;;  %v157_v43 = vadd.f32 %v3642_v10, %v92_v35  ;;  %v478_v53 = vadd.f32 %v3346_v49, %v414_v26  ;;  %v3666_v12 = vld [vmem:[%s4254_s0 + $0x154] sm:$0xff] }
  0x95   :  { %v1086_v18 = vadd.f32 %v1054_v2, %v797_v31  ;;  %v1599_v6 = vadd.f32 %v3520_v25, %v1535_v30  ;;  %v1727_v38 = vmul.f32 0.0573, %v3407_v15  ;;  %v896_v11 = vadd.f32 %v3256_v33, %v3431_v45  ;;  %v3678_v30 = vld [vmem:[%s4254_s0 + $0x152] sm:$0xff] }
  0x96   :  { %1790 = vst.msk [vmem:[%s4255_s1 + $0x88] sm:$0xff] %vm1772_vm0, %v1757_v5  ;;  %v1184_v62 = vadd.f32 %v3382_v32, %v3370_v46  ;;  %v734_v36 = vadd.f32 %v3654_v23, %v670_v61  ;;  %v1055_v29 = vmul.f32 0.039, %v1023_v37  ;;  %v543_v2 = vadd.f32 %v3538_v21, %v478_v53  ;;  %v3683_v40 = vld [vmem:[%s4254_s0 + $0x151] sm:$0xff] }
  0x97   :  { %v1374_v47 = vadd.f32 %v1342_v54, %v1086_v18  ;;  %v221_v51 = vadd.f32 %v3666_v12, %v157_v43  ;;  %v960_v1 = vadd.f32 %v3455_v55, %v896_v11  ;;  %v1472_v46 = vadd.f32 %v3362_v39, %v3472_v19  ;;  %v3693_v61 = vld [vmem:[%s4254_s0 + $0x158] sm:$0xff] }
  0x98   :  { %v1248_v33 = vadd.f32 %v3581_v50, %v1184_v62  ;;  %v766_v54 = vmul.f32 0.0354, %v734_v36  ;;  %v1343_v34 = vmul.f32 0.0473, %v1311_v9  ;;  %v607_v37 = vadd.f32 %v3557_v4, %v543_v2 }
  0x99   :  { %v1662_v32 = vadd.f32 %v1630_v24, %v1374_v47  ;;  %v1631_v31 = vmul.f32 0.052, %v1599_v6  ;;  %v1024_v35 = vadd.f32 %v3678_v30, %v960_v1  ;;  %v1536_v26 = vadd.f32 %v3488_v13, %v1472_v46  ;;  %v3699_v6 = vld [vmem:[%s4254_s0 + $0x153] sm:$0xff] }
  0x9a   :  { %v93_v5 = vadd.f32 %v3290_v7, %v3271_v14  ;;  %v798_v9 = vadd.f32 %v766_v54, %v252_v41  ;;  %v671_v18 = vadd.f32 %v3683_v40, %v607_v37  ;;  %v415_v43 = vadd.f32 %v3376_v63, %v1183_v20  ;;  %v3712_v41 = vld [vmem:[%s4254_s0 + $0x15c] sm:$0xff] }
  0x9b   :  { %v1758_v24 = vadd.f32 %v1726_v48, %v1662_v32  ;;  %v253_v53 = vmul.f32 0.0265, %v221_v51  ;;  %v1312_v11 = vadd.f32 %v3593_v59, %v1248_v33  ;;  %v1600_v14 = vadd.f32 %v3573_v8, %v1536_v26 }
  0x9c   :  { %v158_v7 = vadd.f32 %v3693_v61, %v93_v5  ;;  %v1087_v48 = vadd.f32 %v1055_v29, %v798_v9  ;;  %v735_v20 = vadd.f32 %v3699_v6, %v671_v18  ;;  %v479_v47 = vadd.f32 %v3395_v28, %v415_v43  ;;  %v3736_v18 = vld [vmem:[%s4254_s0 + $0x159] sm:$0xff] }
  0x9d   :  { %1791 = vst.msk [vmem:[%s4255_s1 + $0x90] sm:$0xff] %vm1772_vm0, %v1758_v24  ;;  %v897_v36 = vadd.f32 %v3309_v52, %v3482_v17  ;;  %v1056_v2 = vmul.f32 0.039, %v1024_v35  ;;  %v1185_v1 = vadd.f32 %v3443_v57, %v3425_v22  ;;  %v1473_v29 = vadd.f32 %v3407_v15, %v3525_v16  ;;  %v3731_v57 = vld [vmem:[%s4254_s0 + $0x15a] sm:$0xff] }
  0x9e   :  { %v222_v51 = vadd.f32 %v3712_v41, %v158_v7  ;;  %v1375_v33 = vadd.f32 %v1343_v34, %v1087_v48  ;;  %v767_v46 = vmul.f32 0.0354, %v735_v20  ;;  %v544_v32 = vadd.f32 %v3587_v27, %v479_v47  ;;  %v3749_v20 = vld [vmem:[%s4254_s0 + $0x168] sm:$0xff]  ;;  %v3754_v47 = vld [vmem:[%s4254_s0 + $0x15b] sm:$0xff] }
  0x9f   :  { %v961_v54 = vadd.f32 %v3501_v44, %v897_v36  ;;  %v1344_v37 = vmul.f32 0.0473, %v1312_v11  ;;  %v1728_v26 = vmul.f32 0.0573, %v3467_v56  ;;  %v1249_v52 = vadd.f32 %v3636_v42, %v1185_v1 }
  0xa0   :  { %v1537_v35 = vadd.f32 %v3543_v58, %v1473_v29  ;;  %v1663_v5 = vadd.f32 %v1631_v31, %v1375_v33  ;;  %v799_v24 = vadd.f32 %v767_v46, %v253_v53  ;;  %v1632_v9 = vmul.f32 0.052, %v1600_v14 }
  0xa1   :  { %v608_v22 = vadd.f32 %v3606_v0, %v544_v32  ;;  %v254_v34 = vmul.f32 0.0265, %v222_v51  ;;  %v1025_v43 = vadd.f32 %v3731_v57, %v961_v54  ;;  %v94_v31 = vadd.f32 %v3346_v49, %v3327_v3  ;;  %v3768_v51 = vld [vmem:[%s4254_s0 + $0x16c] sm:$0xff] }
  0xa2   :  { %v416_v53 = vadd.f32 %v3431_v45, %v1184_v62  ;;  %v1759_v11 = vadd.f32 %v1727_v38, %v1663_v5  ;;  %v1088_v14 = vadd.f32 %v1056_v2, %v799_v24  ;;  %v3744_v48 = vmul.f32 0.0573, %v3520_v25 }
  0xa3   :  { %v672_v7 = vadd.f32 %v3736_v18, %v608_v22  ;;  %v1313_v3 = vadd.f32 %v3654_v23, %v1249_v52  ;;  %v1601_v49 = vadd.f32 %v3618_v60, %v1537_v35  ;;  %v159_v38 = vadd.f32 %v3749_v20, %v94_v31 }
  0xa4   :  { %v480_v62 = vadd.f32 %v3455_v55, %v416_v53  ;;  %1792 = vst.msk [vmem:[%s4255_s1 + $0x98] sm:$0xff] %vm1772_vm0, %v1759_v11  ;;  %v1376_v36 = vadd.f32 %v1344_v37, %v1088_v14  ;;  %v898_v29 = vadd.f32 %v3362_v39, %v3538_v21  ;;  %v1186_v33 = vadd.f32 %v3488_v13, %v3472_v19  ;;  %v3784_v19 = vld [vmem:[%s4254_s0 + $0x16a] sm:$0xff] }
  0xa5   :  { %v736_v2 = vadd.f32 %v3754_v47, %v672_v7  ;;  %v1057_v46 = vmul.f32 0.039, %v1025_v43  ;;  %v223_v32 = vadd.f32 %v3768_v51, %v159_v38  ;;  %v1474_v37 = vadd.f32 %v3467_v56, %v3581_v50  ;;  %v3792_v11 = vld [vmem:[%s4254_s0 + $0x169] sm:$0xff] }
  0xa6   :  { %v545_v54 = vadd.f32 %v3642_v10, %v480_v62  ;;  %v1664_v52 = vadd.f32 %v1632_v9, %v1376_v36  ;;  %v962_v5 = vadd.f32 %v3557_v4, %v898_v29  ;;  %v1250_v24 = vadd.f32 %v3683_v40, %v1186_v33  ;;  %v3798_v7 = vld [vmem:[%s4254_s0 + $0x170] sm:$0xff] }
  0xa7   :  { %v768_v35 = vmul.f32 0.0354, %v736_v2  ;;  %v1345_v22 = vmul.f32 0.0473, %v1313_v3  ;;  %v1538_v13 = vadd.f32 %v3593_v59, %v1474_v37  ;;  %v95_v43 = vadd.f32 %v3395_v28, %v3376_v63  ;;  %v3804_v63 = vld [vmem:[%s4254_s0 + $0x16b] sm:$0xff]  ;;  %v3817_v36 = vld [vmem:[%s4254_s0 + $0x174] sm:$0xff] }
  0xa8   :  { %v609_v39 = vadd.f32 %v3666_v12, %v545_v54  ;;  %v1760_v31 = vadd.f32 %v1728_v26, %v1664_v52  ;;  %v1633_v53 = vmul.f32 0.052, %v1601_v49  ;;  %v1026_v14 = vadd.f32 %v3784_v19, %v962_v5  ;;  %v3829_v52 = vld [vmem:[%s4254_s0 + $0x172] sm:$0xff] }
  0xa9   :  { %v800_v9 = vadd.f32 %v768_v35, %v254_v34  ;;  %v1314_v28 = vadd.f32 %v3699_v6, %v1250_v24  ;;  %v160_v26 = vadd.f32 %v3798_v7, %v95_v43  ;;  %v417_v34 = vadd.f32 %v3482_v17, %v1185_v1 }
  0xaa   :  { %v673_v3 = vadd.f32 %v3792_v11, %v609_v39  ;;  %1793 = vst.msk [vmem:[%s4255_s1 + $0xa0] sm:$0xff] %vm1772_vm0, %v1760_v31  ;;  %v255_v38 = vmul.f32 0.0265, %v223_v32  ;;  %v1730_v62 = vmul.f32 0.0573, %v3573_v8  ;;  %v899_v2 = vadd.f32 %v3407_v15, %v3587_v27 }
  0xab   :  { %v1089_v49 = vadd.f32 %v1057_v46, %v800_v9  ;;  %v1602_v1 = vadd.f32 %v3678_v30, %v1538_v13  ;;  %v224_v54 = vadd.f32 %v3817_v36, %v160_v26  ;;  %v481_v37 = vadd.f32 %v3501_v44, %v417_v34 }
  0xac   :  { %v737_v29 = vadd.f32 %v3804_v63, %v673_v3  ;;  %v963_v32 = vadd.f32 %v3606_v0, %v899_v2  ;;  %v1187_v35 = vadd.f32 %v3543_v58, %v3525_v16  ;;  %v1475_v15 = vadd.f32 %v3520_v25, %v3636_v42 }
  0xad   :  { %v1377_v46 = vadd.f32 %v1345_v22, %v1089_v49  ;;  %v1058_v24 = vmul.f32 0.039, %v1026_v14  ;;  %v1346_v39 = vmul.f32 0.0473, %v1314_v28  ;;  %v546_v13 = vadd.f32 %v3693_v61, %v481_v37 }
  0xae   :  { %v769_v5 = vmul.f32 0.0354, %v737_v29  ;;  %v1027_v22 = vadd.f32 %v3829_v52, %v963_v32  ;;  %v1251_v31 = vadd.f32 %v3736_v18, %v1187_v35  ;;  %v1539_v9 = vadd.f32 %v3654_v23, %v1475_v15 }
  0xaf   :  { %v1665_v43 = vadd.f32 %v1633_v53, %v1377_v46  ;;  %v610_v26 = vadd.f32 %v3712_v41, %v546_v13  ;;  %v96_v16 = vadd.f32 %v3455_v55, %v3431_v45  ;;  %v418_v58 = vadd.f32 %v3538_v21, %v1186_v33  ;;  %v3847_v53 = vld [vmem:[%s4254_s0 + $0x171] sm:$0xff]  ;;  %v3883_v13 = vld [vmem:[%s4254_s0 + $0x182] sm:$0xff] }
  0xb0   :  { %v801_v3 = vadd.f32 %v769_v5, %v255_v38  ;;  %v1634_v28 = vmul.f32 0.052, %v1602_v1  ;;  %v256_v34 = vmul.f32 0.0265, %v224_v54  ;;  %v1315_v49 = vadd.f32 %v3754_v47, %v1251_v31  ;;  %v3853_v38 = vld [vmem:[%s4254_s0 + $0x180] sm:$0xff]  ;;  %v3865_v33 = vld [vmem:[%s4254_s0 + $0x173] sm:$0xff] }
  0xb1   :  { %v1761_v14 = vadd.f32 %v3744_v48, %v1665_v43  ;;  %v674_v45 = vadd.f32 %v3847_v53, %v610_v26  ;;  %v161_v55 = vadd.f32 %v3853_v38, %v96_v16  ;;  %v482_v48 = vadd.f32 %v3557_v4, %v418_v58  ;;  %v3877_v5 = vld [vmem:[%s4254_s0 + $0x184] sm:$0xff] }
  0xb2   :  { %v1090_v2 = vadd.f32 %v1058_v24, %v801_v3  ;;  %v1603_v29 = vadd.f32 %v3731_v57, %v1539_v9  ;;  %v1731_v1 = vmul.f32 0.0573, %v3618_v60  ;;  %v900_v54 = vadd.f32 %v3467_v56, %v3642_v10  ;;  %v3899_v16 = vld [vmem:[%s4254_s0 + $0x183] sm:$0xff] }
  0xb3   :  { %1794 = vst.msk [vmem:[%s4255_s1 + $0xa8] sm:$0xff] %vm1772_vm0, %v1761_v14  ;;  %v1188_v37 = vadd.f32 %v3593_v59, %v3581_v50  ;;  %v738_v32 = vadd.f32 %v3865_v33, %v674_v45  ;;  %v1059_v15 = vmul.f32 0.039, %v1027_v22  ;;  %v547_v24 = vadd.f32 %v3749_v20, %v482_v48  ;;  %v3889_v50 = vld [vmem:[%s4254_s0 + $0x181] sm:$0xff] }
  0xb4   :  { %v1378_v46 = vadd.f32 %v1346_v39, %v1090_v2  ;;  %v225_v56 = vadd.f32 %v3877_v5, %v161_v55  ;;  %v964_v59 = vadd.f32 %v3666_v12, %v900_v54  ;;  %v1476_v43 = vadd.f32 %v3573_v8, %v3683_v40 }
  0xb5   :  { %v1252_v39 = vadd.f32 %v3792_v11, %v1188_v37  ;;  %v770_v31 = vmul.f32 0.0354, %v738_v32  ;;  %v1347_v9 = vmul.f32 0.0473, %v1315_v49  ;;  %v611_v3 = vadd.f32 %v3768_v51, %v547_v24  ;;  %v3909_v49 = vld [vmem:[%s4254_s0 + $0x188] sm:$0xff] }
  0xb6   :  { %v1666_v22 = vadd.f32 %v1634_v28, %v1378_v46  ;;  %v1635_v26 = vmul.f32 0.052, %v1603_v29  ;;  %v1028_v58 = vadd.f32 %v3883_v13, %v964_v59  ;;  %v1540_v14 = vadd.f32 %v3699_v6, %v1476_v43 }
  0xb7   :  { %v97_v2 = vadd.f32 %v3501_v44, %v3482_v17  ;;  %v802_v55 = vadd.f32 %v770_v31, %v256_v34  ;;  %v675_v28 = vadd.f32 %v3889_v50, %v611_v3  ;;  %v419_v48 = vadd.f32 %v3587_v27, %v1187_v35 }
  0xb8   :  { %v1762_v45 = vadd.f32 %v1730_v62, %v1666_v22  ;;  %v257_v29 = vmul.f32 0.0265, %v225_v56  ;;  %v1060_v54 = vmul.f32 0.039, %v1028_v58  ;;  %v1316_v46 = vadd.f32 %v3804_v63, %v1252_v39  ;;  %v3922_v62 = vld [vmem:[%s4254_s0 + $0x18c] sm:$0xff] }
  0xb9   :  { %v162_v32 = vadd.f32 %v3909_v49, %v97_v2  ;;  %v1091_v17 = vadd.f32 %v1059_v15, %v802_v55  ;;  %v739_v44 = vadd.f32 %v3899_v16, %v675_v28  ;;  %v483_v35 = vadd.f32 %v3606_v0, %v419_v48  ;;  %v3952_v28 = vld [vmem:[%s4254_s0 + $0x18b] sm:$0xff] }
  0xba   :  { %1795 = vst.msk [vmem:[%s4255_s1 + $0xb0] sm:$0xff] %vm1772_vm0, %v1762_v45  ;;  %v901_v34 = vadd.f32 %v3520_v25, %v3693_v61  ;;  %v1604_v24 = vadd.f32 %v3784_v19, %v1540_v14  ;;  %v1189_v59 = vadd.f32 %v3654_v23, %v3636_v42  ;;  %v1477_v15 = vadd.f32 %v3618_v60, %v3736_v18  ;;  %v3938_v25 = vld [vmem:[%s4254_s0 + $0x18a] sm:$0xff] }
  0xbb   :  { %v226_v56 = vadd.f32 %v3922_v62, %v162_v32  ;;  %v1379_v39 = vadd.f32 %v1347_v9, %v1091_v17  ;;  %v771_v43 = vmul.f32 0.0354, %v739_v44  ;;  %v548_v22 = vadd.f32 %v3798_v7, %v483_v35  ;;  %v3944_v42 = vld [vmem:[%s4254_s0 + $0x189] sm:$0xff] }
  0xbc   :  { %v965_v31 = vadd.f32 %v3712_v41, %v901_v34  ;;  %v1732_v3 = vmul.f32 0.0573, %v3678_v30  ;;  %v1253_v23 = vadd.f32 %v3847_v53, %v1189_v59  ;;  %v1541_v9 = vadd.f32 %v3754_v47, %v1477_v15 }
  0xbd   :  { %v1667_v58 = vadd.f32 %v1635_v26, %v1379_v39  ;;  %v803_v14 = vadd.f32 %v771_v43, %v257_v29  ;;  %v1348_v2 = vmul.f32 0.0473, %v1316_v46  ;;  %v612_v45 = vadd.f32 %v3817_v36, %v548_v22  ;;  %v3962_v46 = vld [vmem:[%s4254_s0 + $0x198] sm:$0xff] }
  0xbe   :  { %v1636_v55 = vmul.f32 0.052, %v1604_v24  ;;  %v1029_v48 = vadd.f32 %v3938_v25, %v965_v31  ;;  %v98_v32 = vadd.f32 %v3557_v4, %v3538_v21  ;;  %v420_v17 = vadd.f32 %v3642_v10, %v1188_v37  ;;  %v3976_v37 = vld [vmem:[%s4254_s0 + $0x19c] sm:$0xff] }
  0xbf   :  { %v1763_v44 = vadd.f32 %v1731_v1, %v1667_v58  ;;  %v1092_v35 = vadd.f32 %v1060_v54, %v803_v14  ;;  %v258_v26 = vmul.f32 0.0265, %v226_v56  ;;  %v676_v29 = vadd.f32 %v3944_v42, %v612_v45  ;;  %v3989_v58 = vld [vmem:[%s4254_s0 + $0x199] sm:$0xff] }
  0xc0   :  { %v1317_v34 = vadd.f32 %v3865_v33, %v1253_v23  ;;  %v1605_v24 = vadd.f32 %v3829_v52, %v1541_v9  ;;  %v163_v15 = vadd.f32 %v3962_v46, %v98_v32  ;;  %v484_v21 = vadd.f32 %v3666_v12, %v420_v17 }
  0xc1   :  { %1796 = vst.msk [vmem:[%s4255_s1 + $0xb8] sm:$0xff] %vm1772_vm0, %v1763_v44  ;;  %v1380_v4 = vadd.f32 %v1348_v2, %v1092_v35  ;;  %v740_v1 = vadd.f32 %v3952_v28, %v676_v29  ;;  %v902_v54 = vadd.f32 %v3573_v8, %v3749_v20  ;;  %v1190_v56 = vadd.f32 %v3699_v6, %v3683_v40  ;;  %v3995_v40 = vld [vmem:[%s4254_s0 + $0x19a] sm:$0xff] }
  0xc2   :  { %v1061_v39 = vmul.f32 0.039, %v1029_v48  ;;  %v227_v43 = vadd.f32 %v3976_v37, %v163_v15  ;;  %v549_v22 = vadd.f32 %v3853_v38, %v484_v21  ;;  %v1478_v31 = vadd.f32 %v3678_v30, %v3792_v11  ;;  %v4006_v35 = vld [vmem:[%s4254_s0 + $0x19b] sm:$0xff] }
  0xc3   :  { %v1668_v23 = vadd.f32 %v1636_v55, %v1380_v4  ;;  %v772_v9 = vmul.f32 0.0354, %v740_v1  ;;  %v966_v8 = vadd.f32 %v3768_v51, %v902_v54  ;;  %v1254_v6 = vadd.f32 %v3889_v50, %v1190_v56  ;;  %v4011_v29 = vld [vmem:[%s4254_s0 + $0x1a0] sm:$0xff] }
  0xc4   :  { %v1733_v14 = vmul.f32 0.0573, %v3731_v57  ;;  %v613_v2 = vadd.f32 %v3877_v5, %v549_v22  ;;  %v1542_v45 = vadd.f32 %v3804_v63, %v1478_v31  ;;  %v99_v55 = vadd.f32 %v3606_v0, %v3587_v27  ;;  %v4037_v31 = vld [vmem:[%s4254_s0 + $0x1a2] sm:$0xff] }
  0xc5   :  { %v1764_v48 = vadd.f32 %v1732_v3, %v1668_v23  ;;  %v804_v32 = vadd.f32 %v772_v9, %v258_v26  ;;  %v1349_v17 = vmul.f32 0.0473, %v1317_v34  ;;  %v1637_v44 = vmul.f32 0.052, %v1605_v24  ;;  %v4025_v24 = vld [vmem:[%s4254_s0 + $0x1a4] sm:$0xff] }
  0xc6   :  { %v677_v15 = vadd.f32 %v3989_v58, %v613_v2  ;;  %v1030_v21 = vadd.f32 %v3995_v40, %v966_v8  ;;  %v164_v27 = vadd.f32 %v4011_v29, %v99_v55  ;;  %v421_v0 = vadd.f32 %v3693_v61, %v1189_v59 }
  0xc7   :  { %1797 = vst.msk [vmem:[%s4255_s1 + $0xc0] sm:$0xff] %vm1772_vm0, %v1764_v48  ;;  %v1093_v3 = vadd.f32 %v1061_v39, %v804_v32  ;;  %v259_v26 = vmul.f32 0.0265, %v227_v43  ;;  %v1318_v34 = vadd.f32 %v3899_v16, %v1254_v6  ;;  %v903_v4 = vadd.f32 %v3618_v60, %v3798_v7  ;;  %v4048_v48 = vld [vmem:[%s4254_s0 + $0x1a1] sm:$0xff] }
  0xc8   :  { %v741_v1 = vadd.f32 %v4006_v35, %v677_v15  ;;  %v1606_v59 = vadd.f32 %v3883_v13, %v1542_v45  ;;  %v228_v54 = vadd.f32 %v4025_v24, %v164_v27  ;;  %v485_v22 = vadd.f32 %v3712_v41, %v421_v0 }
  0xc9   :  { %v1381_v39 = vadd.f32 %v1349_v17, %v1093_v3  ;;  %v967_v43 = vadd.f32 %v3817_v36, %v903_v4  ;;  %v1191_v23 = vadd.f32 %v3754_v47, %v3736_v18  ;;  %v1479_v60 = vadd.f32 %v3731_v57, %v3847_v53  ;;  %v4059_v3 = vld [vmem:[%s4254_s0 + $0x1a3] sm:$0xff] }
  0xca   :  { %v773_v9 = vmul.f32 0.0354, %v741_v1  ;;  %v1062_v8 = vmul.f32 0.039, %v1030_v21  ;;  %v1734_v6 = vmul.f32 0.0573, %v3784_v19  ;;  %v550_v2 = vadd.f32 %v3909_v49, %v485_v22 }
  0xcb   :  { %v1669_v45 = vadd.f32 %v1637_v44, %v1381_v39  ;;  %v1350_v55 = vmul.f32 0.0473, %v1318_v34  ;;  %v1255_v32 = vadd.f32 %v3944_v42, %v1191_v23  ;;  %v1543_v18 = vadd.f32 %v3865_v33, %v1479_v60  ;;  %v4085_v60 = vld [vmem:[%s4254_s0 + $0x1b4] sm:$0xff] }
  0xcc   :  { %v805_v47 = vadd.f32 %v773_v9, %v259_v26  ;;  %v614_v17 = vadd.f32 %v3922_v62, %v550_v2  ;;  %v100_v15 = vadd.f32 %v3666_v12, %v3642_v10  ;;  %v422_v21 = vadd.f32 %v3749_v20, %v1190_v56  ;;  %v4065_v26 = vld [vmem:[%s4254_s0 + $0x1b0] sm:$0xff] }
  0xcd   :  { %v1765_v27 = vadd.f32 %v1733_v14, %v1669_v45  ;;  %v1638_v44 = vmul.f32 0.052, %v1606_v59  ;;  %v260_v0 = vmul.f32 0.0265, %v228_v54  ;;  %v1031_v34 = vadd.f32 %v4037_v31, %v967_v43 }
  0xce   :  { %v1094_v4 = vadd.f32 %v1062_v8, %v805_v47  ;;  %v678_v10 = vadd.f32 %v4048_v48, %v614_v17  ;;  %v165_v12 = vadd.f32 %v4065_v26, %v100_v15  ;;  %v486_v56 = vadd.f32 %v3768_v51, %v422_v21  ;;  %v4091_v8 = vld [vmem:[%s4254_s0 + $0x1b2] sm:$0xff] }
  0xcf   :  { %1798 = vst.msk [vmem:[%s4255_s1 + $0xc8] sm:$0xff] %vm1772_vm0, %v1765_v27  ;;  %v1319_v14 = vadd.f32 %v3952_v28, %v1255_v32  ;;  %v1735_v1 = vmul.f32 0.0573, %v3829_v52  ;;  %v904_v59 = vadd.f32 %v3678_v30, %v3853_v38  ;;  %v1192_v54 = vadd.f32 %v3804_v63, %v3792_v11  ;;  %v4097_v11 = vld [vmem:[%s4254_s0 + $0x1b1] sm:$0xff] }
  0xd0   :  { %v1382_v22 = vadd.f32 %v1350_v55, %v1094_v4  ;;  %v742_v39 = vadd.f32 %v4059_v3, %v678_v10  ;;  %v1607_v43 = vadd.f32 %v3938_v25, %v1543_v18  ;;  %v551_v9 = vadd.f32 %v3962_v46, %v486_v56  ;;  %v4107_v15 = vld [vmem:[%s4254_s0 + $0x1b3] sm:$0xff] }
  0xd1   :  { %v229_v30 = vadd.f32 %v4085_v60, %v165_v12  ;;  %v968_v63 = vadd.f32 %v3877_v5, %v904_v59  ;;  %v1256_v2 = vadd.f32 %v3989_v58, %v1192_v54  ;;  %v1480_v45 = vadd.f32 %v3784_v19, %v3889_v50 }
  0xd2   :  { %v1670_v55 = vadd.f32 %v1638_v44, %v1382_v22  ;;  %v774_v32 = vmul.f32 0.0354, %v742_v39  ;;  %v1063_v18 = vmul.f32 0.039, %v1031_v34  ;;  %v615_v47 = vadd.f32 %v3976_v37, %v551_v9  ;;  %v4117_v34 = vld [vmem:[%s4254_s0 + $0x1b8] sm:$0xff] }
  0xd3   :  { %v1351_v17 = vmul.f32 0.0473, %v1319_v14  ;;  %v1032_v21 = vadd.f32 %v4091_v8, %v968_v63  ;;  %v1544_v27 = vadd.f32 %v3899_v16, %v1480_v45  ;;  %v101_v4 = vadd.f32 %v3712_v41, %v3693_v61  ;;  %v4138_v45 = vld [vmem:[%s4254_s0 + $0x1bc] sm:$0xff] }
  0xd4   :  { %v1766_v10 = vadd.f32 %v1734_v6, %v1670_v55  ;;  %v806_v12 = vadd.f32 %v774_v32, %v260_v0  ;;  %v679_v44 = vadd.f32 %v4097_v11, %v615_v47  ;;  %v423_v56 = vadd.f32 %v3798_v7, %v1191_v23  ;;  %v4145_v32 = vld [vmem:[%s4254_s0 + $0x1ba] sm:$0xff] }
  0xd5   :  { %v1639_v14 = vmul.f32 0.052, %v1607_v43  ;;  %v261_v59 = vmul.f32 0.0265, %v229_v30  ;;  %v1320_v22 = vadd.f32 %v4006_v35, %v1256_v2  ;;  %v166_v39 = vadd.f32 %v4117_v34, %v101_v4 }
  0xd6   :  { %1799 = vst.msk [vmem:[%s4255_s1 + $0xd0] sm:$0xff] %vm1772_vm0, %v1766_v10  ;;  %v1095_v61 = vadd.f32 %v1063_v18, %v806_v12  ;;  %v743_v41 = vadd.f32 %v4107_v15, %v679_v44  ;;  %v487_v6 = vadd.f32 %v3817_v36, %v423_v56  ;;  %v905_v0 = vadd.f32 %v3731_v57, %v3909_v49  ;;  %v4152_v18 = vld [vmem:[%s4254_s0 + $0x1b9] sm:$0xff]  ;;  %v1839_v10 = vld [vmem:[%s4254_s0 + $0x1c8] sm:$0xff] }
  0xd7   :  { %v1064_v23 = vmul.f32 0.039, %v1032_v21  ;;  %v1608_v43 = vadd.f32 %v3995_v40, %v1544_v27  ;;  %v1193_v9 = vadd.f32 %v3865_v33, %v3847_v53  ;;  %v1481_v30 = vadd.f32 %v3829_v52, %v3944_v42  ;;  %v4162_v12 = vld [vmem:[%s4254_s0 + $0x1bb] sm:$0xff] }
  0xd8   :  { %v1383_v63 = vadd.f32 %v1351_v17, %v1095_v61  ;;  %v775_v2 = vmul.f32 0.0354, %v743_v41  ;;  %v552_v55 = vadd.f32 %v4011_v29, %v487_v6  ;;  %v969_v57 = vadd.f32 %v3922_v62, %v905_v0 }
  0xd9   :  { %v1736_v53 = vmul.f32 0.0573, %v3883_v13  ;;  %v230_v33 = vadd.f32 %v4138_v45, %v166_v39  ;;  %v1257_v47 = vadd.f32 %v4048_v48, %v1193_v9  ;;  %v1352_v27 = vmul.f32 0.0473, %v1320_v22 }
  0xda   :  { %v1671_v17 = vadd.f32 %v1639_v14, %v1383_v63  ;;  %v807_v21 = vadd.f32 %v775_v2, %v261_v59  ;;  %v616_v4 = vadd.f32 %v4025_v24, %v552_v55  ;;  %v1033_v44 = vadd.f32 %v4145_v32, %v969_v57 }
  0xdb   :  { %v1545_v56 = vadd.f32 %v3952_v28, %v1481_v30  ;;  %v102_v14 = vadd.f32 %v3768_v51, %v3749_v20  ;;  %v424_v59 = vadd.f32 %v3853_v38, %v1192_v54  ;;  %v1640_v61 = vmul.f32 0.052, %v1608_v43  ;;  %v1871_v51 = vld [vmem:[%s4254_s0 + $0x1cc] sm:$0xff] }
  0xdc   :  { %v1767_v22 = vadd.f32 %v1735_v1, %v1671_v17  ;;  %v1096_v39 = vadd.f32 %v1064_v23, %v807_v21  ;;  %v680_v41 = vadd.f32 %v4152_v18, %v616_v4  ;;  %v262_v6 = vmul.f32 0.0265, %v230_v33  ;;  %v2159_v43 = vld [vmem:[%s4254_s0 + $0x1ca] sm:$0xff] }
  0xdd   :  { %v1321_v0 = vadd.f32 %v4059_v3, %v1257_v47  ;;  %v167_v63 = vadd.f32 %v1839_v10, %v102_v14  ;;  %v488_v2 = vadd.f32 %v3877_v5, %v424_v59  ;;  %v906_v38 = vadd.f32 %v3784_v19, %v3962_v46  ;;  %v2031_v19 = vld [vmem:[%s4254_s0 + $0x1c9] sm:$0xff] }
  0xde   :  { %1800 = vst.msk [vmem:[%s4255_s1 + $0xd8] sm:$0xff] %vm1772_vm0, %v1767_v22  ;;  %v1384_v30 = vadd.f32 %v1352_v27, %v1096_v39  ;;  %v744_v20 = vadd.f32 %v4162_v12, %v680_v41  ;;  %v1194_v1 = vadd.f32 %v3899_v16, %v3889_v50  ;;  %v1065_v54 = vmul.f32 0.039, %v1033_v44 }
  0xdf   :  { %v1609_v5 = vadd.f32 %v4037_v31, %v1545_v56  ;;  %v553_v23 = vadd.f32 %v4065_v26, %v488_v2  ;;  %v1482_v55 = vadd.f32 %v3883_v13, %v3989_v58  ;;  %v970_v50 = vadd.f32 %v3976_v37, %v906_v38  ;;  %v2063_v13 = vld [vmem:[%s4254_s0 + $0x1cb] sm:$0xff] }
  0xe0   :  { %v1672_v57 = vadd.f32 %v1640_v61, %v1384_v30  ;;  %v776_v33 = vmul.f32 0.0354, %v744_v20  ;;  %v1258_v16 = vadd.f32 %v4097_v11, %v1194_v1  ;;  %v1353_v46 = vmul.f32 0.0473, %v1321_v0  ;;  %v1840_v37 = vld [vmem:[%s4254_s0 + $0x1d0] sm:$0xff] }
  0xe1   :  { %v231_v47 = vadd.f32 %v1871_v51, %v167_v63  ;;  %v617_v26 = vadd.f32 %v4085_v60, %v553_v23  ;;  %v103_v17 = vadd.f32 %v3817_v36, %v3798_v7  ;;  %v1034_v58 = vadd.f32 %v2159_v43, %v970_v50  ;;  %v2160_v0 = vld [vmem:[%s4254_s0 + $0x1d2] sm:$0xff] }
  0xe2   :  { %v1768_v21 = vadd.f32 %v1736_v53, %v1672_v57  ;;  %v808_v27 = vadd.f32 %v776_v33, %v262_v6  ;;  %v1546_v4 = vadd.f32 %v4006_v35, %v1482_v55  ;;  %v1737_v11 = vmul.f32 0.0573, %v3938_v25 }
  0xe3   :  { %v681_v10 = vadd.f32 %v2031_v19, %v617_v26  ;;  %v425_v60 = vadd.f32 %v3909_v49, %v1193_v9  ;;  %v1641_v36 = vmul.f32 0.052, %v1609_v5  ;;  %v1322_v53 = vadd.f32 %v4107_v15, %v1258_v16  ;;  %v1872_v9 = vld [vmem:[%s4254_s0 + $0x1d4] sm:$0xff] }
  0xe4   :  { %1801 = vst.msk [vmem:[%s4255_s1 + $0xe0] sm:$0xff] %vm1772_vm0, %v1768_v21  ;;  %v1097_v7 = vadd.f32 %v1065_v54, %v808_v27  ;;  %v907_v35 = vadd.f32 %v3829_v52, %v4011_v29  ;;  %v263_v44 = vmul.f32 0.0265, %v231_v47  ;;  %v168_v14 = vadd.f32 %v1840_v37, %v103_v17 }
  0xe5   :  { %v745_v56 = vadd.f32 %v2063_v13, %v681_v10  ;;  %v489_v59 = vadd.f32 %v3922_v62, %v425_v60  ;;  %v1066_v39 = vmul.f32 0.039, %v1034_v58  ;;  %v1610_v49 = vadd.f32 %v4091_v8, %v1546_v4  ;;  %v2032_v8 = vld [vmem:[%s4254_s0 + $0x1d1] sm:$0xff] }
  0xe6   :  { %v1385_v22 = vadd.f32 %v1353_v46, %v1097_v7  ;;  %v1195_v61 = vadd.f32 %v3952_v28, %v3944_v42  ;;  %v971_v52 = vadd.f32 %v4025_v24, %v907_v35  ;;  %v1483_v29 = vadd.f32 %v3938_v25, %v4048_v48  ;;  %v2064_v25 = vld [vmem:[%s4254_s0 + $0x1d3] sm:$0xff] }
  0xe7   :  { %v777_v15 = vmul.f32 0.0354, %v745_v56  ;;  %v554_v41 = vadd.f32 %v4117_v34, %v489_v59  ;;  %v1354_v6 = vmul.f32 0.0473, %v1322_v53  ;;  %v232_v42 = vadd.f32 %v1872_v9, %v168_v14 }
  0xe8   :  { %v1673_v62 = vadd.f32 %v1641_v36, %v1385_v22  ;;  %v1259_v34 = vadd.f32 %v4152_v18, %v1195_v61  ;;  %v1642_v2 = vmul.f32 0.052, %v1610_v49  ;;  %v1035_v20 = vadd.f32 %v2160_v0, %v971_v52 }
  0xe9   :  { %v809_v63 = vadd.f32 %v777_v15, %v263_v44  ;;  %v618_v28 = vadd.f32 %v4138_v45, %v554_v41  ;;  %v1547_v51 = vadd.f32 %v4059_v3, %v1483_v29  ;;  %v1738_v45 = vmul.f32 0.0573, %v3995_v40 }
  0xea   :  { %v1769_v24 = vadd.f32 %v1737_v11, %v1673_v62  ;;  %v264_v18 = vmul.f32 0.0265, %v232_v42  ;;  %v1323_v54 = vadd.f32 %v4162_v12, %v1259_v34  ;;  %v1067_v43 = vmul.f32 0.039, %v1035_v20 }
  0xeb   :  { %v1098_v48 = vadd.f32 %v1066_v39, %v809_v63  ;;  %v682_v30 = vadd.f32 %v2032_v8, %v618_v28  ;;  %v1611_v55 = vadd.f32 %v4145_v32, %v1547_v51  ;;  %v1739_v16 = vmul.f32 0.0573, %v4037_v31 }
  0xec   :  { %1802 = vst.msk [vmem:[%s4255_s1 + $0xe8] sm:$0xff] %vm1772_vm0, %v1769_v24  ;;  %v1355_v3 = vmul.f32 0.0473, %v1323_v54 }
  0xed   :  { %v1386_v38 = vadd.f32 %v1354_v6, %v1098_v48  ;;  %v746_v1 = vadd.f32 %v2064_v25, %v682_v30  ;;  %v1643_v40 = vmul.f32 0.052, %v1611_v55 }
  0xef   :  { %v1674_v5 = vadd.f32 %v1642_v2, %v1386_v38  ;;  %v778_v23 = vmul.f32 0.0354, %v746_v1 }
  0xf1   :  { %v1770_v57 = vadd.f32 %v1738_v45, %v1674_v5  ;;  %v810_v33 = vadd.f32 %v778_v23, %v264_v18 }
  0xf3   :  { %1803 = vst.msk [vmem:[%s4255_s1 + $0xf0] sm:$0xff] %vm1772_vm0, %v1770_v57  ;;  %v1099_v19 = vadd.f32 %v1067_v43, %v810_v33 }
  0xf5   :  { %v1387_v50 = vadd.f32 %v1355_v3, %v1099_v19 }
  0xf7   :  { %v1675_v46 = vadd.f32 %v1643_v40, %v1387_v50 }
  0xf9   :  { %v1771_v12 = vadd.f32 %v1739_v16, %v1675_v46 }
  0xfb   :  { %1804 = vst.msk [vmem:[%s4255_s1 + $0xf8] sm:$0xff] %vm1772_vm0, %v1771_v12 }

</bundles_post_ra>
